<compile_context>
chip_gen: v6e
topology: v6e:2x2x1
jax: 0.10.0
libtpu: 0.0.40
codegen_flags: <defaults>
</compile_context>

<pallas_src>
import jax
import jax.numpy as jnp
from jax.experimental import pallas as pl
from jax.experimental.pallas import tpu as pltpu

TEMPERATURE = 10.0
SKIP_FACTOR = 0.3
PAD_INDEX = -1.0
LEAKY_SLOPE = 0.01  # torch.nn.LeakyReLU default negative_slope
SKIP_OVER_TEMP = SKIP_FACTOR / TEMPERATURE  # 1/T folded into the skip term


def _round_up(n, m):
    return ((n + m - 1) // m) * m


def autodis_kernel(x_ref, w1_ref, b1_ref, w2_ref, b2_ref, me_ref, out_ref):
    # x: (TB, 1) f32
    x = x_ref[...]

    # Linear(1, V) + LeakyReLU.  in_features == 1 => broadcast scale+shift on
    # the VPU: (TB,1)*(1,V) + (1,V) -> (TB,V).
    h_pre = x * w1_ref[...] + b1_ref[...]
    h = jnp.where(h_pre > 0, h_pre, LEAKY_SLOPE * h_pre)

    # logits = (h @ W2 + b2 + skip*h) / T   with 1/T pre-folded into
    # w2_ref / b2_ref / SKIP_OVER_TEMP.  bf16 MXU operands, f32 accumulation.
    logits = (jnp.dot(h.astype(w2_ref.dtype), w2_ref[...],
                      preferred_element_type=jnp.float32)
              + b2_ref[...] + SKIP_OVER_TEMP * h)

    # softmax over the vocab axis (EUP exp + approx reciprocal).
    m = jnp.max(logits, axis=-1, keepdims=True)
    e = jnp.exp(logits - m)
    w = e * pl.reciprocal(jnp.sum(e, axis=-1, keepdims=True), approx=True)

    # (TB,V) @ (V,Dp) -> (TB,Dp), Dp is a multiple of 128 (lane-dense store).
    out = jnp.dot(w.astype(me_ref.dtype), me_ref[...],
                  preferred_element_type=jnp.float32)

    # pad mask: rows where x == pad_index are zeroed (broadcast (TB,1)->(TB,Dp))
    out_ref[...] = jnp.where(x == PAD_INDEX, 0.0, out).astype(out_ref.dtype)


def autodis_forward(x, w1, b1, w2, b2, meta_embedding, *,
                    block_b=256, use_bf16=True):
    """AutoDis forward.

    x: () / (B,) / (B,1) float.  Weights in torch layout:
      w1: (V, 1), b1: (V,)   -- nn.Linear(1, V)
      w2: (V, V), b2: (V,)   -- nn.Linear(V, V)
      meta_embedding: (V, D)
    Returns (B, D) float32.
    """
    assert block_b % 8 == 0, "batch tile must be a multiple of 8 sublanes"
    if x.ndim == 0:
        x = x.reshape(1, 1)
    if x.ndim == 1:
        x = x[:, None]
    x = x.astype(jnp.float32)
    B = x.shape[0]
    V, D = meta_embedding.shape

    # ---- one-time static parameter transforms (outside the kernel) ----
    inv_t = 1.0 / TEMPERATURE
    w1_t = w1.reshape(V, 1).T.astype(jnp.float32)            # (1, V)
    b1_2d = b1.reshape(1, V).astype(jnp.float32)              # (1, V)
    w2_t = w2.T.astype(jnp.float32) * inv_t                   # (V, V), 1/T folded
    b2_2d = b2.reshape(1, V).astype(jnp.float32) * inv_t      # (1, V), 1/T folded

    # lane-dense output: pad the embedding dim to a multiple of 128.
    d_pad = max(128, _round_up(D, 128))
    me = meta_embedding.astype(jnp.float32)
    if d_pad != D:
        me = jnp.pad(me, ((0, 0), (0, d_pad - D)))

    mm_dtype = jnp.bfloat16 if use_bf16 else jnp.float32
    w2_t = w2_t.astype(mm_dtype)
    me = me.astype(mm_dtype)

    # ---- batch tiling: pad B to a multiple of the batch tile ----
    tb = min(block_b, _round_up(B, 8))
    b_pad = _round_up(B, tb)
    x_p = x
    if b_pad != B:
        x_p = jnp.pad(x, ((0, b_pad - B), (0, 0)), constant_values=PAD_INDEX)

    grid = (b_pad // tb,)

    itemsize = lambda a: a.dtype.itemsize
    cost = pl.CostEstimate(
        flops=2 * b_pad * V * V + 2 * b_pad * V * d_pad,
        transcendentals=b_pad * V,
        bytes_accessed=(x_p.size * 4 + w1_t.size * 4 + b1_2d.size * 4
                        + b2_2d.size * 4 + w2_t.size * itemsize(w2_t)
                        + me.size * itemsize(me) + b_pad * d_pad * 4),
    )

    out = pl.pallas_call(
        autodis_kernel,
        out_shape=jax.ShapeDtypeStruct((b_pad, d_pad), jnp.float32),
        grid=grid,
        in_specs=[
            pl.BlockSpec((tb, 1), lambda i: (i, 0)),      # x: streamed per tile
            pl.BlockSpec((1, V), lambda i: (0, 0)),       # w1: resident
            pl.BlockSpec((1, V), lambda i: (0, 0)),       # b1: resident
            pl.BlockSpec((V, V), lambda i: (0, 0)),       # w2: resident
            pl.BlockSpec((1, V), lambda i: (0, 0)),       # b2: resident
            pl.BlockSpec((V, d_pad), lambda i: (0, 0)),   # meta_embedding: resident
        ],
        out_specs=pl.BlockSpec((tb, d_pad), lambda i: (i, 0)),
        compiler_params=pltpu.CompilerParams(
            dimension_semantics=("parallel",)),
        cost_estimate=cost,
    )(x_p, w1_t, b1_2d, w2_t, b2_2d, me)

    return out[:B, :D]


def reference_forward(x, w1, b1, w2, b2, meta_embedding):
    if x.ndim == 1:
        x = x[:, None]
    x = x.astype(jnp.float32)
    h_pre = x @ w1.reshape(-1, 1).T + b1[None, :]
    h = jnp.where(h_pre > 0, h_pre, LEAKY_SLOPE * h_pre)
    xj = h @ w2.T + b2[None, :] + SKIP_FACTOR * h
    weights = jax.nn.softmax(xj / TEMPERATURE, axis=-1)
    out = weights @ meta_embedding
    return jnp.where(x == PAD_INDEX, 0.0, out)


if __name__ == "__main__":
    key = jax.random.PRNGKey(0)
    k_me, k_w1, k_b1, k_w2, k_b2, k_x = jax.random.split(key, 6)

    B = 300          # batch (non-multiple of the tile, exercises padding)
    V = 128          # meta_embedding_vocab_size
    D = 32           # dims

    # Deterministic synthetic parameters (torch layouts).
    meta_embedding = jax.random.normal(k_me, (V, D), dtype=jnp.float32)
    w1 = jax.random.normal(k_w1, (V, 1), dtype=jnp.float32) * 0.5   # Linear(1,V).weight
    b1 = jax.random.normal(k_b1, (V,), dtype=jnp.float32) * 0.1
    w2 = jax.random.normal(k_w2, (V, V), dtype=jnp.float32) * (1.0 / V ** 0.5)
    b2 = jax.random.normal(k_b2, (V,), dtype=jnp.float32) * 0.1

    # Input: (B,) scalar feature per example, a couple set to pad_index.
    x = jax.random.normal(k_x, (B,), dtype=jnp.float32)
    x = x.at[1].set(PAD_INDEX).at[5].set(PAD_INDEX)

    out = autodis_forward(x, w1, b1, w2, b2, meta_embedding)
    jax.block_until_ready(out)

    ref = reference_forward(x, w1, b1, w2, b2, meta_embedding)
    assert out.shape == (B, D)
    max_err = float(jnp.max(jnp.abs(out - ref)))
    # bf16 MXU operands + approx reciprocal => relaxed (but still tight) tol.
    assert jnp.allclose(out, ref, atol=1e-2, rtol=1e-2), (
        f"mismatch vs reference (max abs err {max_err})")
    assert jnp.all(out[1] == 0.0) and jnp.all(out[5] == 0.0), "pad mask failed"

    print("KERNEL_OK")
</pallas_src>

<mosaic_0001>
module attributes {stable_mosaic.version = 11 : i64} {
  func.func @autodis_kernel(%arg0: i32, %arg1: memref<256x1xf32, #tpu.memory_space<vmem>>, %arg2: memref<1x128xf32, #tpu.memory_space<vmem>>, %arg3: memref<1x128xf32, #tpu.memory_space<vmem>>, %arg4: memref<128x128xbf16, #tpu.memory_space<vmem>>, %arg5: memref<1x128xf32, #tpu.memory_space<vmem>>, %arg6: memref<128x128xbf16, #tpu.memory_space<vmem>>, %arg7: memref<256x128xf32, #tpu.memory_space<vmem>>) attributes {dimension_semantics = [#tpu.dimension_semantics<parallel>], iteration_bounds = array<i64: 2>, scalar_prefetch = 0 : i64, scratch_operands = 0 : i64, tpu.core_type = #tpu.core_type<tc>, window_params = [{transform_indices = @transform_0, window_bounds = array<i64: 256, 1>}, {pipeline_mode = #tpu.pipeline_mode<synchronous>, transform_indices = @transform_1, window_bounds = array<i64: 1, 128>}, {pipeline_mode = #tpu.pipeline_mode<synchronous>, transform_indices = @transform_2, window_bounds = array<i64: 1, 128>}, {pipeline_mode = #tpu.pipeline_mode<synchronous>, transform_indices = @transform_3, window_bounds = array<i64: 128, 128>}, {pipeline_mode = #tpu.pipeline_mode<synchronous>, transform_indices = @transform_4, window_bounds = array<i64: 1, 128>}, {pipeline_mode = #tpu.pipeline_mode<synchronous>, transform_indices = @transform_5, window_bounds = array<i64: 128, 128>}, {transform_indices = @transform_6, window_bounds = array<i64: 256, 128>}]} {
    %c0 = arith.constant 0 : index
    %c0_0 = arith.constant 0 : index
    %0 = vector.load %arg1[%c0, %c0_0] : memref<256x1xf32, #tpu.memory_space<vmem>>, vector<256x1xf32>
    %c0_1 = arith.constant 0 : index
    %c0_2 = arith.constant 0 : index
    %1 = vector.load %arg2[%c0_1, %c0_2] : memref<1x128xf32, #tpu.memory_space<vmem>>, vector<1x128xf32>
    %2 = vector.broadcast %0 : vector<256x1xf32> to vector<256x128xf32>
    %3 = vector.broadcast %1 : vector<1x128xf32> to vector<256x128xf32>
    %4 = arith.mulf %2, %3 : vector<256x128xf32>
    %c0_3 = arith.constant 0 : index
    %c0_4 = arith.constant 0 : index
    %5 = vector.load %arg3[%c0_3, %c0_4] : memref<1x128xf32, #tpu.memory_space<vmem>>, vector<1x128xf32>
    %6 = vector.broadcast %5 : vector<1x128xf32> to vector<256x128xf32>
    %7 = arith.addf %4, %6 : vector<256x128xf32>
    %cst = arith.constant 0.000000e+00 : f32
    %8 = vector.broadcast %cst : f32 to vector<256x128xf32>
    %9 = arith.cmpf ogt, %7, %8 : vector<256x128xf32>
    %cst_5 = arith.constant 0.00999999977 : f32
    %10 = vector.broadcast %cst_5 : f32 to vector<256x128xf32>
    %11 = arith.mulf %10, %7 : vector<256x128xf32>
    %12 = arith.select %9, %7, %11 : vector<256x128xi1>, vector<256x128xf32>
    %13 = arith.truncf %12 : vector<256x128xf32> to vector<256x128xbf16>
    %c0_6 = arith.constant 0 : index
    %c0_7 = arith.constant 0 : index
    %14 = vector.load %arg4[%c0_6, %c0_7] : memref<128x128xbf16, #tpu.memory_space<vmem>>, vector<128x128xbf16>
    %cst_8 = arith.constant dense<0.000000e+00> : vector<256x128xf32>
    %15 = tpu.matmul %13, %14, %cst_8 {dimension_numbers = #tpu.dot_dimension_numbers<[1], [0], [0], [1], [0, 0, 1, 1], [], []>} : vector<256x128xbf16>, vector<128x128xbf16>, vector<256x128xf32> -> vector<256x128xf32>
    %c0_9 = arith.constant 0 : index
    %c0_10 = arith.constant 0 : index
    %16 = vector.load %arg5[%c0_9, %c0_10] : memref<1x128xf32, #tpu.memory_space<vmem>>, vector<1x128xf32>
    %17 = vector.broadcast %16 : vector<1x128xf32> to vector<256x128xf32>
    %18 = arith.addf %15, %17 : vector<256x128xf32>
    %cst_11 = arith.constant 3.000000e-02 : f32
    %19 = vector.broadcast %cst_11 : f32 to vector<256x128xf32>
    %20 = arith.mulf %19, %12 : vector<256x128xf32>
    %21 = arith.addf %18, %20 : vector<256x128xf32>
    %cst_12 = arith.constant dense<0xFF800000> : vector<256xf32>
    %22 = vector.multi_reduction <maximumf>, %21, %cst_12 [1] : vector<256x128xf32> to vector<256xf32>
    %23 = vector.shape_cast %22 : vector<256xf32> to vector<256x1xf32>
    %24 = vector.broadcast %23 : vector<256x1xf32> to vector<256x128xf32>
    %25 = arith.subf %21, %24 : vector<256x128xf32>
    %26 = math.exp %25 : vector<256x128xf32>
    %cst_13 = arith.constant dense<0.000000e+00> : vector<256xf32>
    %27 = vector.multi_reduction <add>, %26, %cst_13 [1] : vector<256x128xf32> to vector<256xf32>
    %28 = vector.shape_cast %27 : vector<256xf32> to vector<256x1xf32>
    %29 = tpu.reciprocal %28 {approx = true} : vector<256x1xf32> -> vector<256x1xf32>
    %30 = vector.broadcast %29 : vector<256x1xf32> to vector<256x128xf32>
    %31 = arith.mulf %26, %30 : vector<256x128xf32>
    %32 = arith.truncf %31 : vector<256x128xf32> to vector<256x128xbf16>
    %c0_14 = arith.constant 0 : index
    %c0_15 = arith.constant 0 : index
    %33 = vector.load %arg6[%c0_14, %c0_15] : memref<128x128xbf16, #tpu.memory_space<vmem>>, vector<128x128xbf16>
    %cst_16 = arith.constant dense<0.000000e+00> : vector<256x128xf32>
    %34 = tpu.matmul %32, %33, %cst_16 {dimension_numbers = #tpu.dot_dimension_numbers<[1], [0], [0], [1], [0, 0, 1, 1], [], []>} : vector<256x128xbf16>, vector<128x128xbf16>, vector<256x128xf32> -> vector<256x128xf32>
    %cst_17 = arith.constant -1.000000e+00 : f32
    %35 = vector.broadcast %cst_17 : f32 to vector<256x1xf32>
    %36 = arith.cmpf oeq, %0, %35 : vector<256x1xf32>
    %cst_18 = arith.constant 0.000000e+00 : f32
    %37 = vector.shape_cast %36 : vector<256x1xi1> to vector<256x1xi1>
    %38 = vector.broadcast %37 : vector<256x1xi1> to vector<256x128xi1>
    %39 = vector.broadcast %cst_18 : f32 to vector<256x128xf32>
    %40 = arith.select %38, %39, %34 : vector<256x128xi1>, vector<256x128xf32>
    %c0_19 = arith.constant 0 : index
    %c0_20 = arith.constant 0 : index
    %41 = vector.load %arg7[%c0_19, %c0_20] : memref<256x128xf32, #tpu.memory_space<vmem>>, vector<256x128xf32>
    tpu.vector_store %arg7[%c0_19, %c0_20], %40 {strides = array<i32>} : memref<256x128xf32, #tpu.memory_space<vmem>>, vector<256x128xf32>,
    return
  }
  func.func @transform_0(%arg0: i32) -> (i32, i32) {
    %c0_i32 = arith.constant 0 : i32
    %c0_i32_0 = arith.constant 0 : i32
    return %arg0, %c0_i32 : i32, i32
  }
  func.func @transform_1(%arg0: i32) -> (i32, i32) {
    %c0_i32 = arith.constant 0 : i32
    %c0_i32_0 = arith.constant 0 : i32
    %c0_i32_1 = arith.constant 0 : i32
    return %c0_i32, %c0_i32_0 : i32, i32
  }
  func.func @transform_2(%arg0: i32) -> (i32, i32) {
    %c0_i32 = arith.constant 0 : i32
    %c0_i32_0 = arith.constant 0 : i32
    %c0_i32_1 = arith.constant 0 : i32
    return %c0_i32, %c0_i32_0 : i32, i32
  }
  func.func @transform_3(%arg0: i32) -> (i32, i32) {
    %c0_i32 = arith.constant 0 : i32
    %c0_i32_0 = arith.constant 0 : i32
    %c0_i32_1 = arith.constant 0 : i32
    return %c0_i32, %c0_i32_0 : i32, i32
  }
  func.func @transform_4(%arg0: i32) -> (i32, i32) {
    %c0_i32 = arith.constant 0 : i32
    %c0_i32_0 = arith.constant 0 : i32
    %c0_i32_1 = arith.constant 0 : i32
    return %c0_i32, %c0_i32_0 : i32, i32
  }
  func.func @transform_5(%arg0: i32) -> (i32, i32) {
    %c0_i32 = arith.constant 0 : i32
    %c0_i32_0 = arith.constant 0 : i32
    %c0_i32_1 = arith.constant 0 : i32
    return %c0_i32, %c0_i32_0 : i32, i32
  }
  func.func @transform_6(%arg0: i32) -> (i32, i32) {
    %c0_i32 = arith.constant 0 : i32
    %c0_i32_0 = arith.constant 0 : i32
    return %arg0, %c0_i32 : i32, i32
  }
}

</mosaic_0001>

<bundles_post_ra>
// kernel: tpu_custom_call.1
= control target key start
LH: loop header
LB: loop body
LE: loop exit
PB: predicated region body
PF: predicated region fallthrough
CT: control target
= control target key end

     0   :  { %11 = vsyncpa [#allocation3], 0  ;;  %s3079_s0 = inlined_call_operand.vmem [shape: f32[512,1], index: 0, kind: input, shape index: {}]   ;;  %s3080_s1 = inlined_call_operand.vmem [shape: f32[1,128], index: 1, kind: input, shape index: {}]   ;;  %s3081_s2 = inlined_call_operand.vmem [shape: f32[1,128], index: 2, kind: input, shape index: {}]   ;;  %s3082_s3 = inlined_call_operand.vmem [shape: bf16[128,128], index: 3, kind: input, shape index: {}]   ;;  %s3083_s4 = inlined_call_operand.vmem [shape: f32[1,128], index: 4, kind: input, shape index: {}]   ;;  %s3084_s5 = inlined_call_operand.vmem [shape: bf16[128,128], index: 5, kind: input, shape index: {}]   ;;  %s3085_s6 = inlined_call_operand.hbm [shape: f32[512,128], index: 6, kind: output, shape index: {}]  }
   0x1   :  { %13 = vsyncpa [#allocation3 + $0x1], 0  ;;  %s2290_s21 = smov 0   ;;  %s2292_s22 = smov 0  }
   0x2   :  { %s2294_s23 = smov 0   ;;  %s2296_s24 = smov 0  }
   0x3 LB: > { %s2311_s25 = sadd.s32 4294967295, %s2249_s24   ;;  %s1793_s26 = sadd.s32 4294967294, %s2249_s24   ;;  %s2249_s24 = sphi %s2296_s24, %s3091_s24   ;;  %s2245_s23 = sphi %s2294_s23, %s3090_s23   ;;  %s2241_s22 = sphi %s2292_s22, %s3089_s22   ;;  %s2237_s21 = sphi %s2290_s21, %s3088_s21  }
   0x4   : > { %s2315_s27 = sadd.s32 1, %s2249_s24   ;;  %s157_s28 = sadd.s32 1, %s2245_s23 }
   0x5   : > { %s154_s29 = ssub.s32 %s2249_s24, %s2315_s27  ;;  %p167_p0 = scmp.ne.s32.totalorder %s2245_s23, %s2241_s22 }
   0x6   : > { %p155_p1 = scmp.eq.s32.totalorder %s154_s29, 0  ;;  %p168_p2 = scmp.eq.s32.totalorder %s2311_s25, 1 }
   0x7   : > { %p173_p3 = scmp.ne.s32.totalorder %s2241_s22, %s2237_s21  ;;  %p174_p4 = scmp.eq.s32.totalorder %s1793_s26, 1 }
   0x8   : > { %s2326_s30 = scalar_select %p155_p1, %s2245_s23, %s157_s28  }
   0x9   : > { %p2328_p5 = por %p168_p2, %p167_p0  ;;  %p2332_p6 = por %p174_p4, %p173_p3 }
   0xa   : > { %p1796_p7 = scmp.ge.s32.totalorder %s2249_s24, 1  ;;  %p216_p8 = scmp.lt.s32.totalorder %s2249_s24, 3 }
   0xc   : > { %p217_p9 = pnand %p1796_p7, %p216_p8 }
   0xd   : > { %s1798_s9 = sshll.u32 (!%p217_p9), %s2311_s25, 5  ;;  %s1824_s11 = sshll.u32 (!%p217_p9), %s2311_s25, 12 }
   0xe   : > { %220 = sbr.rel (%p217_p9) target bundleno = 952 (0x3b8), region = 44  ;;  %p247_p10 = scmp.lt.s32.totalorder (!%p217_p9), %s1798_s9, 63 }
   0xf   : > { %s3031_s15 = scalar_lea.hbm (!%p217_p9), %s3085_s6, %s1824_s11  ;;  %s2252_s18 = smov (!%p217_p9), [#allocation2]  }
  0x10   : > { %s2193_s19 = sshll.u32 (!%p217_p9), %s2252_s18, 4  ;;  %s2194_s19 = int_to_ptr.vmem [resolvable:$false] %s2193_s19 }
  0x11   : > { %s2195_s20 = scalar_lea.vmem (!%p217_p9), %s2194_s19, 8192 }
  0x13   : > { %v2251_v0 = vmov 0   ;;  %v2013_v1 = vld [vmem:[%s3082_s3 + $0x38] sm:$0xff]   ;;  %v2014_v2 = vld [vmem:[%s3082_s3 + $0x30] sm:$0xff]   ;;  %s3093_s9 = smov (!%p247_p10, %s1798_s9), 63  ;;  %v2015_v3 = vld [vmem:[%s3082_s3 + $0x28] sm:$0xff]  }
  0x14   : > { %2012 = vset.pattern.permute.xlu1 %v2251_v0  ;;  %2011 = vset.pattern.permute.xlu0 %v2251_v0  ;;  %s1799_s14 = sshll.u32 %s3093_s9, 3  ;;  %v2016_v8 = vld [vmem:[%s3082_s3 + $0x20] sm:$0xff]   ;;  %v2017_v11 = vld [vmem:[%s3082_s3 + $0x18] sm:$0xff]   ;;  %v2018_v14 = vld [vmem:[%s3082_s3 + $0x10] sm:$0xff]  }
  0x15   : > { %1873 = vmatprep.subr.bf16.mxu0 %v2013_v1  ;;  %s2350_s17 = scalar_lea.vmem %s3079_s0, %s1799_s14  ;;  %v2019_v17 = vld [vmem:[%s3082_s3 + $0x8] sm:$0xff]   ;;  %v2020_v20 = vld [vmem:[%s3082_s3] sm:$0xff]  }
  0x16   : > { %1874 = vmatpush3.bf16.msra.mxu0 %v2013_v1  ;;  %v256_v4 = vld [vmem:[%s2350_s17 + $0x10] sm:$0xff]  ;;  %v254_v5 = vld [vmem:[%s2350_s17] sm:$0xff]  ;;  %v257_v6 = vld [vmem:[%s2350_s17 + $0x18] sm:$0xff] }
  0x17   : > { %1875 = vmatprep.subr.bf16.mxu0 %v2014_v2  ;;  %299 = vperm.xlu1 %2012, %v256_v4   ;;  %v255_v7 = vld [vmem:[%s2350_s17 + $0x8] sm:$0xff]  ;;  %v258_v10 = vld [vmem:[%s2350_s17 + $0x20] sm:$0xff]  ;;  %v261_v12 = vld [vmem:[%s2350_s17 + $0x38] sm:$0xff] }
  0x18   : > { %289 = vperm.xlu0 %2011, %v254_v5   ;;  %v259_v9 = vld [vmem:[%s2350_s17 + $0x28] sm:$0xff]  ;;  %v260_v13 = vld [vmem:[%s2350_s17 + $0x30] sm:$0xff]  ;;  %v262_v16 = vld [vmem:[%s2350_s17 + $0x40] sm:$0xff] }
  0x19   : > { %v263_v15 = vld [vmem:[%s2350_s17 + $0x48] sm:$0xff]  ;;  %v265_v18 = vld [vmem:[%s2350_s17 + $0x58] sm:$0xff]  ;;  %v264_v19 = vld [vmem:[%s2350_s17 + $0x50] sm:$0xff] }
  0x1a   : > { %1876 = vmatpush3.bf16.msra.mxu0 %v2014_v2  ;;  %v267_v21 = vld [vmem:[%s2350_s17 + $0x68] sm:$0xff]  ;;  %v266_v22 = vld [vmem:[%s2350_s17 + $0x60] sm:$0xff]  ;;  %v269_v23 = vld [vmem:[%s2350_s17 + $0x78] sm:$0xff] }
  0x1b   : > { %1877 = vmatprep.subr.bf16.mxu0 %v2015_v3  ;;  %304 = vperm.xlu1 %2012, %v257_v6   ;;  %v268_v24 = vld [vmem:[%s2350_s17 + $0x70] sm:$0xff]  ;;  %v271_v25 = vld [vmem:[%s2350_s17 + $0x88] sm:$0xff]  ;;  %v270_v26 = vld [vmem:[%s2350_s17 + $0x80] sm:$0xff] }
  0x1c   : > { %294 = vperm.xlu0 %2011, %v255_v7   ;;  %v273_v27 = vld [vmem:[%s2350_s17 + $0x98] sm:$0xff]  ;;  %v272_v28 = vld [vmem:[%s2350_s17 + $0x90] sm:$0xff]  ;;  %v275_v29 = vld [vmem:[%s2350_s17 + $0xa8] sm:$0xff] }
  0x1d   : > { %v274_v30 = vld [vmem:[%s2350_s17 + $0xa0] sm:$0xff]  ;;  %v277_v31 = vld [vmem:[%s2350_s17 + $0xb8] sm:$0xff]  ;;  %v276_v32 = vld [vmem:[%s2350_s17 + $0xb0] sm:$0xff] }
  0x1e   : > { %1878 = vmatpush3.bf16.msra.mxu0 %v2015_v3  ;;  %v279_v33 = vld [vmem:[%s2350_s17 + $0xc8] sm:$0xff]  ;;  %v278_v34 = vld [vmem:[%s2350_s17 + $0xc0] sm:$0xff]  ;;  %v281_v35 = vld [vmem:[%s2350_s17 + $0xd8] sm:$0xff] }
  0x1f   : > { %1879 = vmatprep.subr.bf16.mxu0 %v2016_v8  ;;  %314 = vperm.xlu1 %2012, %v259_v9   ;;  %v280_v36 = vld [vmem:[%s2350_s17 + $0xd0] sm:$0xff]  ;;  %v283_v37 = vld [vmem:[%s2350_s17 + $0xe8] sm:$0xff]  ;;  %v282_v38 = vld [vmem:[%s2350_s17 + $0xe0] sm:$0xff] }
  0x20   : > { %309 = vperm.xlu0 %2011, %v258_v10   ;;  %v285_v39 = vld [vmem:[%s2350_s17 + $0xf8] sm:$0xff]  ;;  %v284_v40 = vld [vmem:[%s2350_s17 + $0xf0] sm:$0xff]  ;;  %v2405_v41 = vld [vmem:[%s3080_s1] ss:$0 sm:$0xff] }
  0x21   : > { %v2410_v42 = vld [vmem:[%s3081_s2] ss:$0 sm:$0xff] }
  0x22   : > { %1880 = vmatpush3.bf16.msra.mxu0 %v2016_v8 }
  0x23   : > { %1881 = vmatprep.subr.bf16.mxu0 %v2017_v11  ;;  %324 = vperm.xlu1 %2012, %v261_v12  }
  0x24   : > { %319 = vperm.xlu0 %2011, %v260_v13  }
  0x26   : > { %1882 = vmatpush3.bf16.msra.mxu0 %v2017_v11 }
  0x27   : > { %1883 = vmatprep.subr.bf16.mxu0 %v2018_v14  ;;  %334 = vperm.xlu1 %2012, %v263_v15  }
  0x28   : > { %329 = vperm.xlu0 %2011, %v262_v16  }
  0x2a   : > { %1884 = vmatpush3.bf16.msra.mxu0 %v2018_v14 }
  0x2b   : > { %1885 = vmatprep.subr.bf16.mxu0 %v2019_v17  ;;  %344 = vperm.xlu1 %2012, %v265_v18  }
  0x2c   : > { %339 = vperm.xlu0 %2011, %v264_v19  }
  0x2e   : > { %1886 = vmatpush3.bf16.msra.mxu0 %v2019_v17 }
  0x2f   : > { %1887 = vmatprep.subr.bf16.mxu0 %v2020_v20  ;;  %354 = vperm.xlu1 %2012, %v267_v21  }
  0x30   : > { %349 = vperm.xlu0 %2011, %v266_v22  }
  0x32   : > { %1888 = vmatpush3.bf16.msra.mxu0 %v2020_v20 }
  0x33   : > { %364 = vperm.xlu1 %2012, %v269_v23  }
  0x34   : > { %359 = vperm.xlu0 %2011, %v268_v24  }
  0x37   : > { %374 = vperm.xlu1 %2012, %v271_v25  }
  0x38   : > { %369 = vperm.xlu0 %2011, %v270_v26  }
  0x3b   : > { %384 = vperm.xlu1 %2012, %v273_v27  }
  0x3c   : > { %379 = vperm.xlu0 %2011, %v272_v28  }
  0x3f   : > { %394 = vperm.xlu1 %2012, %v275_v29  }
  0x40   : > { %389 = vperm.xlu0 %2011, %v274_v30  }
  0x43   : > { %404 = vperm.xlu1 %2012, %v277_v31  }
  0x44   : > { %399 = vperm.xlu0 %2011, %v276_v32  }
  0x47   : > { %414 = vperm.xlu1 %2012, %v279_v33  }
  0x48   : > { %409 = vperm.xlu0 %2011, %v278_v34  }
  0x4b   : > { %424 = vperm.xlu1 %2012, %v281_v35  }
  0x4c   : > { %419 = vperm.xlu0 %2011, %v280_v36  }
  0x4f   : > { %434 = vperm.xlu1 %2012, %v283_v37  }
  0x50   : > { %429 = vperm.xlu0 %2011, %v282_v38  }
  0x53   : > { %444 = vperm.xlu1 %2012, %v285_v39  }
  0x54   : > { %439 = vperm.xlu0 %2011, %v284_v40  }
  0x92   : > { %v300_v43 = vpop.permute.xlu1 %299 }
  0x93   : > { %v290_v44 = vpop.permute.xlu0 %289  ;;  %v455_v45 = vmul.f32 %v2405_v41, %v300_v43 }
  0x94   : > { %v453_v46 = vmul.f32 %v2405_v41, %v290_v44 }
  0x95   : > { %v494_v47 = vadd.f32 %v2410_v42, %v455_v45 }
  0x96   : > { %v492_v48 = vadd.f32 %v2410_v42, %v453_v46  ;;  %v305_v49 = vpop.permute.xlu1 %304 }
  0x97   : > { %v295_v50 = vpop.permute.xlu0 %294  ;;  %v456_v51 = vmul.f32 %v2405_v41, %v305_v49  ;;  %v558_v53 = vmul.f32 0.01, %v494_v47  ;;  %vm526_vm1 = vcmp.gt.f32.partialorder %v494_v47, 0.0 }
  0x98   : > { %v454_v52 = vmul.f32 %v2405_v41, %v295_v50  ;;  %vm524_vm0 = vcmp.gt.f32.partialorder %v492_v48, 0.0  ;;  %v556_v58 = vmul.f32 0.01, %v492_v48 }
  0x99   : > { %v495_v54 = vadd.f32 %v2410_v42, %v456_v51  ;;  %v2424_v2 = vsel %vm526_vm1, %v494_v47, %v558_v53 }
  0x9a   : > { %v493_v55 = vadd.f32 %v2410_v42, %v454_v52  ;;  %v315_v56 = vpop.permute.xlu1 %314  ;;  %v2428_v6 = vsel %vm524_vm0, %v492_v48, %v556_v58 }
  0x9b   : > { %v310_v57 = vpop.permute.xlu0 %309  ;;  %v559_v59 = vmul.f32 0.01, %v495_v54  ;;  %v458_v60 = vmul.f32 %v2405_v41, %v315_v56  ;;  %vm527_vm3 = vcmp.gt.f32.partialorder %v495_v54, 0.0 }
  0x9c   : > { %v457_v61 = vmul.f32 %v2405_v41, %v310_v57  ;;  %vm525_vm2 = vcmp.gt.f32.partialorder %v493_v55, 0.0  ;;  %v557_v62 = vmul.f32 0.01, %v493_v55 }
  0x9d   : > { %v497_v63 = vadd.f32 %v2410_v42, %v458_v60  ;;  %v2426_v3 = vsel %vm527_vm3, %v495_v54, %v559_v59 }
  0x9e   : > { %v496_v1 = vadd.f32 %v2410_v42, %v457_v61  ;;  %v325_v4 = vpop.permute.xlu1 %324  ;;  %v2430_v7 = vsel %vm525_vm2, %v493_v55, %v557_v62  ;;  %v621_v8 = vpack.c.bf16 %v2426_v3, %v2424_v2 }
  0x9f   : > { %v320_v5 = vpop.permute.xlu0 %319  ;;  %v561_v9 = vmul.f32 0.01, %v497_v63  ;;  %v460_v11 = vmul.f32 %v2405_v41, %v325_v4  ;;  %v620_v13 = vpack.c.bf16 %v2430_v7, %v2428_v6  ;;  %vm529_vm5 = vcmp.gt.f32.partialorder %v497_v63, 0.0 }
  0xa0   : > { %v560_v10 = vmul.f32 0.01, %v496_v1  ;;  %v459_v12 = vmul.f32 %v2405_v41, %v320_v5  ;;  %vm528_vm4 = vcmp.gt.f32.partialorder %v496_v1, 0.0 }
  0xa1   : > { %v499_v14 = vadd.f32 %v2410_v42, %v460_v11  ;;  %v2442_v17 = vsel %vm529_vm5, %v497_v63, %v561_v9  ;;  %1889 = vmatprep.mubr.bf16.mxu0 %v620_v13 }
  0xa2   : > { %v498_v15 = vadd.f32 %v2410_v42, %v459_v12  ;;  %v2440_v16 = vsel %vm528_vm4, %v496_v1, %v560_v10  ;;  %v335_v18 = vpop.permute.xlu1 %334  ;;  %1890 = vmatmul.mubr.bf16.vlgmr.msra.gmra.mxu0 %v621_v8 }
  0xa3   : > { %v330_v19 = vpop.permute.xlu0 %329  ;;  %v622_v20 = vpack.c.bf16 %v2442_v17, %v2440_v16  ;;  %v563_v21 = vmul.f32 0.01, %v499_v14  ;;  %v462_v23 = vmul.f32 %v2405_v41, %v335_v18  ;;  %vm531_vm7 = vcmp.gt.f32.partialorder %v499_v14, 0.0 }
  0xa4   : > { %v562_v22 = vmul.f32 0.01, %v498_v15  ;;  %v461_v24 = vmul.f32 %v2405_v41, %v330_v19  ;;  %vm530_vm6 = vcmp.gt.f32.partialorder %v498_v15, 0.0 }
  0xa5   : > { %1893 = vmatprep.mubr.bf16.mxu0 %v622_v20  ;;  %v501_v25 = vadd.f32 %v2410_v42, %v462_v23  ;;  %v2452_v28 = vsel %vm531_vm7, %v499_v14, %v563_v21 }
  0xa6   : > { %v500_v26 = vadd.f32 %v2410_v42, %v461_v24  ;;  %v2450_v27 = vsel %vm530_vm6, %v498_v15, %v562_v22  ;;  %v345_v29 = vpop.permute.xlu1 %344 }
  0xa7   : > { %v340_v30 = vpop.permute.xlu0 %339  ;;  %v623_v31 = vpack.c.bf16 %v2452_v28, %v2450_v27  ;;  %v565_v32 = vmul.f32 0.01, %v501_v25  ;;  %v464_v34 = vmul.f32 %v2405_v41, %v345_v29  ;;  %vm533_vm9 = vcmp.gt.f32.partialorder %v501_v25, 0.0 }
  0xa8   : > { %v564_v33 = vmul.f32 0.01, %v500_v26  ;;  %v463_v35 = vmul.f32 %v2405_v41, %v340_v30  ;;  %vm532_vm8 = vcmp.gt.f32.partialorder %v500_v26, 0.0 }
  0xa9   : > { %v503_v36 = vadd.f32 %v2410_v42, %v464_v34  ;;  %v2462_v39 = vsel %vm533_vm9, %v501_v25, %v565_v32 }
  0xaa   : > { %v502_v37 = vadd.f32 %v2410_v42, %v463_v35  ;;  %v2460_v38 = vsel %vm532_vm8, %v500_v26, %v564_v33  ;;  %v355_v40 = vpop.permute.xlu1 %354  ;;  %1894 = vmatmul.mubr.bf16.gmra.mxu0 %v623_v31 }
  0xab   : > { %v350_v43 = vpop.permute.xlu0 %349  ;;  %v624_v44 = vpack.c.bf16 %v2462_v39, %v2460_v38  ;;  %v567_v45 = vmul.f32 0.01, %v503_v36  ;;  %v466_v47 = vmul.f32 %v2405_v41, %v355_v40  ;;  %vm535_vm11 = vcmp.gt.f32.partialorder %v503_v36, 0.0 }
  0xac   : > { %v566_v46 = vmul.f32 0.01, %v502_v37  ;;  %v465_v48 = vmul.f32 %v2405_v41, %v350_v43  ;;  %vm534_vm10 = vcmp.gt.f32.partialorder %v502_v37, 0.0 }
  0xad   : > { %1897 = vmatprep.mubr.bf16.mxu0 %v624_v44  ;;  %v505_v49 = vadd.f32 %v2410_v42, %v466_v47  ;;  %v2472_v52 = vsel %vm535_vm11, %v503_v36, %v567_v45 }
  0xae   : > { %v504_v50 = vadd.f32 %v2410_v42, %v465_v48  ;;  %v2470_v51 = vsel %vm534_vm10, %v502_v37, %v566_v46  ;;  %v365_v53 = vpop.permute.xlu1 %364 }
  0xaf   : > { %v360_v54 = vpop.permute.xlu0 %359  ;;  %v625_v55 = vpack.c.bf16 %v2472_v52, %v2470_v51  ;;  %v569_v56 = vmul.f32 0.01, %v505_v49  ;;  %v468_v58 = vmul.f32 %v2405_v41, %v365_v53  ;;  %vm537_vm13 = vcmp.gt.f32.partialorder %v505_v49, 0.0 }
  0xb0   : > { %v568_v57 = vmul.f32 0.01, %v504_v50  ;;  %v467_v59 = vmul.f32 %v2405_v41, %v360_v54  ;;  %vm536_vm12 = vcmp.gt.f32.partialorder %v504_v50, 0.0 }
  0xb1   : > { %v507_v60 = vadd.f32 %v2410_v42, %v468_v58  ;;  %v2482_v63 = vsel %vm537_vm13, %v505_v49, %v569_v56 }
  0xb2   : > { %v506_v61 = vadd.f32 %v2410_v42, %v467_v59  ;;  %v2480_v62 = vsel %vm536_vm12, %v504_v50, %v568_v57  ;;  %v375_v1 = vpop.permute.xlu1 %374  ;;  %1898 = vmatmul.mubr.bf16.gmra.mxu0 %v625_v55 }
  0xb3   : > { %v370_v4 = vpop.permute.xlu0 %369  ;;  %v626_v5 = vpack.c.bf16 %v2482_v63, %v2480_v62  ;;  %v571_v8 = vmul.f32 0.01, %v507_v60  ;;  %v470_v10 = vmul.f32 %v2405_v41, %v375_v1  ;;  %vm539_vm15 = vcmp.gt.f32.partialorder %v507_v60, 0.0 }
  0xb4   : > { %v570_v9 = vmul.f32 0.01, %v506_v61  ;;  %v469_v11 = vmul.f32 %v2405_v41, %v370_v4  ;;  %vm538_vm14 = vcmp.gt.f32.partialorder %v506_v61, 0.0 }
  0xb5   : > { %1901 = vmatprep.mubr.bf16.mxu0 %v626_v5  ;;  %v509_v12 = vadd.f32 %v2410_v42, %v470_v10  ;;  %v2492_v15 = vsel %vm539_vm15, %v507_v60, %v571_v8 }
  0xb6   : > { %v508_v13 = vadd.f32 %v2410_v42, %v469_v11  ;;  %v2490_v14 = vsel %vm538_vm14, %v506_v61, %v570_v9  ;;  %v385_v18 = vpop.permute.xlu1 %384 }
  0xb7   : > { %v380_v19 = vpop.permute.xlu0 %379  ;;  %v627_v20 = vpack.c.bf16 %v2492_v15, %v2490_v14  ;;  %v573_v21 = vmul.f32 0.01, %v509_v12  ;;  %v472_v23 = vmul.f32 %v2405_v41, %v385_v18  ;;  %vm541_vm1 = vcmp.gt.f32.partialorder %v509_v12, 0.0 }
  0xb8   : > { %v572_v22 = vmul.f32 0.01, %v508_v13  ;;  %v471_v24 = vmul.f32 %v2405_v41, %v380_v19  ;;  %vm540_vm0 = vcmp.gt.f32.partialorder %v508_v13, 0.0 }
  0xb9   : > { %v511_v25 = vadd.f32 %v2410_v42, %v472_v23  ;;  %v2502_v30 = vsel %vm541_vm1, %v509_v12, %v573_v21 }
  0xba   : > { %v510_v26 = vadd.f32 %v2410_v42, %v471_v24  ;;  %v2500_v29 = vsel %vm540_vm0, %v508_v13, %v572_v22  ;;  %v395_v31 = vpop.permute.xlu1 %394  ;;  %1902 = vmatmul.mubr.bf16.gmra.mxu0 %v627_v20 }
  0xbb   : > { %v390_v32 = vpop.permute.xlu0 %389  ;;  %v628_v33 = vpack.c.bf16 %v2502_v30, %v2500_v29  ;;  %v575_v34 = vmul.f32 0.01, %v511_v25  ;;  %v474_v36 = vmul.f32 %v2405_v41, %v395_v31  ;;  %vm543_vm3 = vcmp.gt.f32.partialorder %v511_v25, 0.0 }
  0xbc   : > { %v574_v35 = vmul.f32 0.01, %v510_v26  ;;  %v473_v37 = vmul.f32 %v2405_v41, %v390_v32  ;;  %vm542_vm2 = vcmp.gt.f32.partialorder %v510_v26, 0.0 }
  0xbd   : > { %1905 = vmatprep.mubr.bf16.mxu0 %v628_v33  ;;  %v513_v40 = vadd.f32 %v2410_v42, %v474_v36  ;;  %v2512_v45 = vsel %vm543_vm3, %v511_v25, %v575_v34 }
  0xbe   : > { %v512_v43 = vadd.f32 %v2410_v42, %v473_v37  ;;  %v2510_v44 = vsel %vm542_vm2, %v510_v26, %v574_v35  ;;  %v405_v46 = vpop.permute.xlu1 %404 }
  0xbf   : > { %v400_v47 = vpop.permute.xlu0 %399  ;;  %v629_v48 = vpack.c.bf16 %v2512_v45, %v2510_v44  ;;  %v577_v49 = vmul.f32 0.01, %v513_v40  ;;  %v476_v53 = vmul.f32 %v2405_v41, %v405_v46  ;;  %vm545_vm5 = vcmp.gt.f32.partialorder %v513_v40, 0.0 }
  0xc0   : > { %v576_v50 = vmul.f32 0.01, %v512_v43  ;;  %v475_v54 = vmul.f32 %v2405_v41, %v400_v47  ;;  %vm544_vm4 = vcmp.gt.f32.partialorder %v512_v43, 0.0 }
  0xc1   : > { %v515_v55 = vadd.f32 %v2410_v42, %v476_v53  ;;  %v2522_v58 = vsel %vm545_vm5, %v513_v40, %v577_v49 }
  0xc2   : > { %v514_v56 = vadd.f32 %v2410_v42, %v475_v54  ;;  %v2520_v57 = vsel %vm544_vm4, %v512_v43, %v576_v50  ;;  %v415_v59 = vpop.permute.xlu1 %414  ;;  %1906 = vmatmul.mubr.bf16.gmra.mxu0 %v629_v48 }
  0xc3   : > { %v410_v60 = vpop.permute.xlu0 %409  ;;  %v630_v61 = vpack.c.bf16 %v2522_v58, %v2520_v57  ;;  %v579_v1 = vmul.f32 0.01, %v515_v55  ;;  %v478_v5 = vmul.f32 %v2405_v41, %v415_v59  ;;  %vm547_vm7 = vcmp.gt.f32.partialorder %v515_v55, 0.0 }
  0xc4   : > { %v578_v4 = vmul.f32 0.01, %v514_v56  ;;  %v477_v8 = vmul.f32 %v2405_v41, %v410_v60  ;;  %vm546_vm6 = vcmp.gt.f32.partialorder %v514_v56, 0.0 }
  0xc5   : > { %1909 = vmatprep.mubr.bf16.mxu0 %v630_v61  ;;  %v517_v9 = vadd.f32 %v2410_v42, %v478_v5  ;;  %v2532_v12 = vsel %vm547_vm7, %v515_v55, %v579_v1 }
  0xc6   : > { %v516_v10 = vadd.f32 %v2410_v42, %v477_v8  ;;  %v2530_v11 = vsel %vm546_vm6, %v514_v56, %v578_v4  ;;  %v425_v13 = vpop.permute.xlu1 %424 }
  0xc7   : > { %v420_v18 = vpop.permute.xlu0 %419  ;;  %v631_v19 = vpack.c.bf16 %v2532_v12, %v2530_v11  ;;  %v581_v20 = vmul.f32 0.01, %v517_v9  ;;  %v480_v22 = vmul.f32 %v2405_v41, %v425_v13  ;;  %vm549_vm9 = vcmp.gt.f32.partialorder %v517_v9, 0.0 }
  0xc8   : > { %v580_v21 = vmul.f32 0.01, %v516_v10  ;;  %v479_v23 = vmul.f32 %v2405_v41, %v420_v18  ;;  %vm548_vm8 = vcmp.gt.f32.partialorder %v516_v10, 0.0  ;;  %v2575_v18 = vld [vmem:[%s3083_s4] ss:$0 sm:$0xff] }
  0xc9   : > { %v519_v24 = vadd.f32 %v2410_v42, %v480_v22  ;;  %v2542_v31 = vsel %vm549_vm9, %v517_v9, %v581_v20  ;;  %v868_v20 = vmul.f32 0.03, %v2428_v6 }
  0xca   : > { %v518_v25 = vadd.f32 %v2410_v42, %v479_v23  ;;  %v2540_v26 = vsel %vm548_vm8, %v516_v10, %v580_v21  ;;  %v435_v32 = vpop.permute.xlu1 %434  ;;  %1910 = vmatmul.mubr.bf16.gmra.mxu0 %v631_v19 }
  0xcb   : > { %v430_v33 = vpop.permute.xlu0 %429  ;;  %v632_v34 = vpack.c.bf16 %v2542_v31, %v2540_v26  ;;  %v583_v35 = vmul.f32 0.01, %v519_v24  ;;  %v482_v37 = vmul.f32 %v2405_v41, %v435_v32  ;;  %vm551_vm11 = vcmp.gt.f32.partialorder %v519_v24, 0.0 }
  0xcc   : > { %v582_v36 = vmul.f32 0.01, %v518_v25  ;;  %v481_v40 = vmul.f32 %v2405_v41, %v430_v33  ;;  %vm550_vm10 = vcmp.gt.f32.partialorder %v518_v25, 0.0  ;;  %v869_v32 = vmul.f32 0.03, %v2430_v7 }
  0xcd   : > { %1913 = vmatprep.mubr.bf16.mxu0 %v632_v34  ;;  %v521_v43 = vadd.f32 %v2410_v42, %v482_v37  ;;  %v2552_v48 = vsel %vm551_vm11, %v519_v24, %v583_v35  ;;  %v870_v34 = vmul.f32 0.03, %v2424_v2  ;;  %v871_v7 = vmul.f32 0.03, %v2426_v3 }
  0xce   : > { %v520_v46 = vadd.f32 %v2410_v42, %v481_v40  ;;  %v2550_v47 = vsel %vm550_vm10, %v518_v25, %v582_v36  ;;  %v445_v49 = vpop.permute.xlu1 %444  ;;  %v874_v3 = vmul.f32 0.03, %v2450_v27 }
  0xcf   : > { %v440_v50 = vpop.permute.xlu0 %439  ;;  %v633_v53 = vpack.c.bf16 %v2552_v48, %v2550_v47  ;;  %v585_v54 = vmul.f32 0.01, %v521_v43  ;;  %v484_v56 = vmul.f32 %v2405_v41, %v445_v49  ;;  %vm553_vm13 = vcmp.gt.f32.partialorder %v521_v43, 0.0 }
  0xd0   : > { %v584_v55 = vmul.f32 0.01, %v520_v46  ;;  %v483_v59 = vmul.f32 %v2405_v41, %v440_v50  ;;  %vm552_vm12 = vcmp.gt.f32.partialorder %v520_v46, 0.0 }
  0xd1   : > { %v523_v60 = vadd.f32 %v2410_v42, %v484_v56  ;;  %v2562_v4 = vsel %vm553_vm13, %v521_v43, %v585_v54  ;;  %v873_v56 = vmul.f32 0.03, %v2442_v17  ;;  %v876_v17 = vmul.f32 0.03, %v2460_v38 }
  0xd2   : > { %v522_v61 = vadd.f32 %v2410_v42, %v483_v59  ;;  %v2560_v1 = vsel %vm552_vm12, %v520_v46, %v584_v55  ;;  %1914 = vmatmul.mubr.bf16.gmra.mxu0 %v633_v53  ;;  %v872_v46 = vmul.f32 0.03, %v2440_v16 }
  0xd3   : > { %v634_v5 = vpack.c.bf16 %v2562_v4, %v2560_v1  ;;  %vm555_vm14 = vcmp.gt.f32.partialorder %v523_v60, 0.0  ;;  %v587_v8 = vmul.f32 0.01, %v523_v60 }
  0xd4   : > { %vm554_vm15 = vcmp.gt.f32.partialorder %v522_v61, 0.0  ;;  %v586_v9 = vmul.f32 0.01, %v522_v61 }
  0xd5   : > { %1917 = vmatprep.mubr.bf16.mxu0 %v634_v5  ;;  %v2568_v10 = vsel %vm555_vm14, %v523_v60, %v587_v8 }
  0xd6   : > { %v2566_v41 = vsel %vm554_vm15, %v522_v61, %v586_v9  ;;  %v875_v9 = vmul.f32 0.03, %v2452_v28  ;;  %v878_v28 = vmul.f32 0.03, %v2470_v51 }
  0xd7   : > { %v635_v42 = vpack.c.bf16 %v2568_v10, %v2566_v41 }
  0xda   : > { %1918 = vmatmul.mubr.bf16.gmra.mxu0 %v635_v42 }
 0x162   : > { %v1891_v13 = vpop.f32.mrf.mxu0 }
 0x163   : > { %v750_v23 = vadd.f32 %v1891_v13, %v2575_v18 }
 0x164   : > { %v741_v19 = vpop.f32.mrf.mxu0 }
 0x165   : > { %v742_v21 = vadd.f32 %v2575_v18, %v741_v19  ;;  %v2589_v37 = vadd.f32 %v870_v34, %v750_v23 }
 0x166   : > { %v1892_v22 = vpop.f32.mrf.mxu0 }
 0x167   : > { %v2580_v24 = vadd.f32 %v868_v20, %v742_v21  ;;  %v753_v36 = vadd.f32 %v1892_v22, %v2575_v18  ;;  %v877_v22 = vmul.f32 0.03, %v2462_v39  ;;  %v880_v39 = vmul.f32 0.03, %v2480_v62 }
 0x168   : > { %v744_v25 = vpop.f32.mrf.mxu0 }
 0x169   : > { %v745_v33 = vadd.f32 %v2575_v18, %v744_v25  ;;  %932 = vmax.xlane.f32.xlu0 %v2580_v24  ;;  %v2597_v50 = vadd.f32 %v871_v7, %v753_v36 }
 0x16a   : > { %v1895_v35 = vpop.f32.mrf.mxu0 }
 0x16b   : > { %v2587_v6 = vadd.f32 %v869_v32, %v745_v33  ;;  %v766_v2 = vadd.f32 %v1895_v35, %v2575_v18  ;;  %v879_v35 = vmul.f32 0.03, %v2472_v52  ;;  %v882_v52 = vmul.f32 0.03, %v2490_v14 }
 0x16c   : > { %v757_v40 = vpop.f32.mrf.mxu0 }
 0x16d   : > { %v758_v43 = vadd.f32 %v2575_v18, %v757_v40  ;;  %934 = vmax.xlane.f32.xlu1 %v2587_v6  ;;  %936 = vmax.xlane.f32.xlu0 %v2589_v37  ;;  %v2609_v61 = vadd.f32 %v874_v3, %v766_v2 }
 0x16e   : > { %v1896_v49 = vpop.f32.mrf.mxu0 }
 0x16f   : > { %v2599_v53 = vadd.f32 %v872_v46, %v758_v43  ;;  %v769_v16 = vadd.f32 %v1896_v49, %v2575_v18  ;;  %v881_v49 = vmul.f32 0.03, %v2482_v63  ;;  %v884_v63 = vmul.f32 0.03, %v2500_v29 }
 0x170   : > { %v760_v54 = vpop.f32.mrf.mxu0 }
 0x171   : > { %v761_v55 = vadd.f32 %v2575_v18, %v760_v54  ;;  %938 = vmax.xlane.f32.xlu0 %v2597_v50  ;;  %940 = vmax.xlane.f32.xlu1 %v2599_v53  ;;  %v2617_v13 = vadd.f32 %v875_v9, %v769_v16 }
 0x172   : > { %v1899_v59 = vpop.f32.mrf.mxu0 }
 0x173   : > { %v2607_v60 = vadd.f32 %v873_v56, %v761_v55  ;;  %v782_v27 = vadd.f32 %v1899_v59, %v2575_v18  ;;  %v883_v59 = vmul.f32 0.03, %v2492_v15  ;;  %v886_v15 = vmul.f32 0.03, %v2510_v44 }
 0x174   : > { %v773_v5 = vpop.f32.mrf.mxu0 }
 0x175   : > { %v774_v8 = vadd.f32 %v2575_v18, %v773_v5  ;;  %942 = vmax.xlane.f32.xlu0 %v2607_v60  ;;  %944 = vmax.xlane.f32.xlu1 %v2609_v61  ;;  %v2629_v32 = vadd.f32 %v878_v28, %v782_v27 }
 0x176   : > { %v1900_v42 = vpop.f32.mrf.mxu0 }
 0x177   : > { %v2619_v19 = vadd.f32 %v876_v17, %v774_v8  ;;  %v785_v38 = vadd.f32 %v1900_v42, %v2575_v18  ;;  %v885_v42 = vmul.f32 0.03, %v2502_v30  ;;  %v888_v30 = vmul.f32 0.03, %v2520_v57 }
 0x178   : > { %v776_v20 = vpop.f32.mrf.mxu0 }
 0x179   : > { %v777_v21 = vadd.f32 %v2575_v18, %v776_v20  ;;  %946 = vmax.xlane.f32.xlu0 %v2617_v13  ;;  %948 = vmax.xlane.f32.xlu1 %v2619_v19  ;;  %v2637_v40 = vadd.f32 %v879_v35, %v785_v38 }
 0x17a   : > { %v1903_v23 = vpop.f32.mrf.mxu0 }
 0x17b   : > { %v2627_v25 = vadd.f32 %v877_v22, %v777_v21  ;;  %v798_v51 = vadd.f32 %v1903_v23, %v2575_v18  ;;  %v887_v23 = vmul.f32 0.03, %v2512_v45  ;;  %v890_v45 = vmul.f32 0.03, %v2530_v11 }
 0x17c   : > { %v789_v33 = vpop.f32.mrf.mxu0 }
 0x17d   : > { %v790_v34 = vadd.f32 %v2575_v18, %v789_v33  ;;  %950 = vmax.xlane.f32.xlu0 %v2627_v25  ;;  %952 = vmax.xlane.f32.xlu1 %v2629_v32  ;;  %v2649_v55 = vadd.f32 %v882_v52, %v798_v51 }
 0x17e   : > { %v1904_v36 = vpop.f32.mrf.mxu0 }
 0x17f   : > { %v2639_v43 = vadd.f32 %v880_v39, %v790_v34  ;;  %v801_v62 = vadd.f32 %v1904_v36, %v2575_v18  ;;  %v889_v36 = vmul.f32 0.03, %v2522_v58  ;;  %v892_v58 = vmul.f32 0.03, %v2540_v26 }
 0x180   : > { %v792_v7 = vpop.f32.mrf.mxu0 }
 0x181   : > { %v793_v46 = vadd.f32 %v2575_v18, %v792_v7  ;;  %954 = vmax.xlane.f32.xlu0 %v2637_v40  ;;  %956 = vmax.xlane.f32.xlu1 %v2639_v43  ;;  %v2657_v5 = vadd.f32 %v883_v59, %v801_v62 }
 0x182   : > { %v1907_v2 = vpop.f32.mrf.mxu0 }
 0x183   : > { %v2647_v54 = vadd.f32 %v881_v49, %v793_v46  ;;  %v814_v14 = vadd.f32 %v1907_v2, %v2575_v18  ;;  %v891_v2 = vmul.f32 0.03, %v2532_v12  ;;  %v894_v12 = vmul.f32 0.03, %v2550_v47 }
 0x184   : > { %v805_v56 = vpop.f32.mrf.mxu0  ;;  %v899_v47 = vmul.f32 0.03, %v2568_v10 }
 0x185   : > { %v806_v3 = vadd.f32 %v2575_v18, %v805_v56  ;;  %958 = vmax.xlane.f32.xlu0 %v2647_v54  ;;  %960 = vmax.xlane.f32.xlu1 %v2649_v55  ;;  %v2669_v21 = vadd.f32 %v886_v15, %v814_v14 }
 0x186   : > { %v1908_v16 = vpop.f32.mrf.mxu0 }
 0x187   : > { %v2659_v8 = vadd.f32 %v884_v63, %v806_v3  ;;  %v817_v29 = vadd.f32 %v1908_v16, %v2575_v18  ;;  %v893_v16 = vmul.f32 0.03, %v2542_v31  ;;  %v896_v31 = vmul.f32 0.03, %v2560_v1 }
 0x188   : > { %v808_v9 = vpop.f32.mrf.mxu0  ;;  %v898_v1 = vmul.f32 0.03, %v2566_v41 }
 0x189   : > { %v809_v17 = vadd.f32 %v2575_v18, %v808_v9  ;;  %962 = vmax.xlane.f32.xlu0 %v2657_v5  ;;  %964 = vmax.xlane.f32.xlu1 %v2659_v8  ;;  %v2677_v33 = vadd.f32 %v887_v23, %v817_v29 }
 0x18a   : > { %v1911_v27 = vpop.f32.mrf.mxu0 }
 0x18b   : > { %v2667_v20 = vadd.f32 %v885_v42, %v809_v17  ;;  %v830_v44 = vadd.f32 %v1911_v27, %v2575_v18  ;;  %v895_v27 = vmul.f32 0.03, %v2552_v48  ;;  %v897_v48 = vmul.f32 0.03, %v2562_v4 }
 0x18c   : > { %v821_v22 = vpop.f32.mrf.mxu0 }
 0x18d   : > { %v822_v28 = vadd.f32 %v2575_v18, %v821_v22  ;;  %966 = vmax.xlane.f32.xlu0 %v2667_v20  ;;  %968 = vmax.xlane.f32.xlu1 %v2669_v21  ;;  %v2689_v46 = vadd.f32 %v890_v45, %v830_v44 }
 0x18e   : > { %v1912_v38 = vpop.f32.mrf.mxu0 }
 0x18f   : > { %v2679_v34 = vadd.f32 %v888_v30, %v822_v28  ;;  %v833_v57 = vadd.f32 %v1912_v38, %v2575_v18 }
 0x190   : > { %v824_v35 = vpop.f32.mrf.mxu0 }
 0x191   : > { %v825_v39 = vadd.f32 %v2575_v18, %v824_v35  ;;  %970 = vmax.xlane.f32.xlu0 %v2677_v33  ;;  %972 = vmax.xlane.f32.xlu1 %v2679_v34  ;;  %v2697_v56 = vadd.f32 %v891_v2, %v833_v57 }
 0x192   : > { %v1915_v51 = vpop.f32.mrf.mxu0 }
 0x193   : > { %v2687_v7 = vadd.f32 %v889_v36, %v825_v39  ;;  %v846_v11 = vadd.f32 %v1915_v51, %v2575_v18 }
 0x194   : > { %v837_v49 = vpop.f32.mrf.mxu0 }
 0x195   : > { %v838_v52 = vadd.f32 %v2575_v18, %v837_v49  ;;  %974 = vmax.xlane.f32.xlu0 %v2687_v7  ;;  %976 = vmax.xlane.f32.xlu1 %v2689_v46  ;;  %v2709_v17 = vadd.f32 %v894_v12, %v846_v11 }
 0x196   : > { %v1916_v62 = vpop.f32.mrf.mxu0 }
 0x197   : > { %v2699_v3 = vadd.f32 %v892_v58, %v838_v52  ;;  %v849_v26 = vadd.f32 %v1916_v62, %v2575_v18 }
 0x198   : > { %v840_v59 = vpop.f32.mrf.mxu0 }
 0x199   : > { %v841_v63 = vadd.f32 %v2575_v18, %v840_v59  ;;  %978 = vmax.xlane.f32.xlu0 %v2697_v56  ;;  %980 = vmax.xlane.f32.xlu1 %v2699_v3  ;;  %v2719_v23 = vadd.f32 %v895_v27, %v849_v26 }
 0x19a   : > { %v1919_v14 = vpop.f32.mrf.mxu0 }
 0x19b   : > { %v2707_v9 = vadd.f32 %v893_v16, %v841_v63  ;;  %v862_v22 = vadd.f32 %v1919_v14, %v2575_v18 }
 0x19c   : > { %v853_v42 = vpop.f32.mrf.mxu0 }
 0x19d   : > { %v854_v15 = vadd.f32 %v2575_v18, %v853_v42  ;;  %982 = vmax.xlane.f32.xlu0 %v2707_v9  ;;  %984 = vmax.xlane.f32.xlu1 %v2709_v17  ;;  %v2732_v39 = vadd.f32 %v898_v1, %v862_v22 }
 0x19e   : > { %v1920_v29 = vpop.f32.mrf.mxu0 }
 0x19f   : > { %v865_v28 = vadd.f32 %v1920_v29, %v2575_v18  ;;  %v2721_v30 = vadd.f32 %v896_v31, %v854_v15 }
 0x1a0   : > { %v856_v38 = vpop.f32.mrf.mxu0 }
 0x1a1   : > { %v857_v44 = vadd.f32 %v2575_v18, %v856_v38  ;;  %986 = vmax.xlane.f32.xlu0 %v2719_v23  ;;  %988 = vmax.xlane.f32.xlu1 %v2721_v30  ;;  %v2728_v10 = vadd.f32 %v899_v47, %v865_v28 }
 0x1a3   : > { %v2730_v35 = vadd.f32 %v897_v48, %v857_v44 }
 0x1a5   : > { %990 = vmax.xlane.f32.xlu0 %v2730_v35  ;;  %992 = vmax.xlane.f32.xlu1 %v2732_v39 }
 0x1a9   : > { %994 = vmax.xlane.f32.xlu0 %v2728_v10 }
 0x1f2   : > { %v933_v18 = vpop.xlane.xlu0 %932 }
 0x1f3   : > { %v996_v36 = vsub.f32 %v2580_v24, %v933_v18  ;;  %v2022_v18 = vld [vmem:[%s3084_s5 + $0x30] sm:$0xff]  }
 0x1f5   : > { %v1028_v45 = vmul.f32 1.442695, %v996_v36 }
 0x1f6   : > { %v935_v51 = vpop.xlane.xlu1 %934  ;;  %v937_v4 = vpop.xlane.xlu0 %936 }
 0x1f7   : > { %2029 = vpow2.f32 %v1028_v45  ;;  %v997_v41 = vsub.f32 %v2587_v6, %v935_v51  ;;  %v998_v57 = vsub.f32 %v2589_v37, %v937_v4 }
 0x1f9   : > { %v1030_v49 = vmul.f32 1.442695, %v997_v41  ;;  %v1032_v52 = vmul.f32 1.442695, %v998_v57 }
 0x1fa   : > { %v941_v2 = vpop.xlane.xlu1 %940  ;;  %v939_v58 = vpop.xlane.xlu0 %938 }
 0x1fb   : > { %2031 = vpow2.f32 %v1030_v49  ;;  %v1000_v62 = vsub.f32 %v2599_v53, %v941_v2  ;;  %v999_v11 = vsub.f32 %v2597_v50, %v939_v58  ;;  %v2023_v49 = vld [vmem:[%s3084_s5 + $0x28] sm:$0xff]  }
 0x1fc   : > { %2033 = vpow2.f32 %v1032_v52 }
 0x1fd   : > { %v1036_v59 = vmul.f32 1.442695, %v1000_v62  ;;  %v1034_v24 = vmul.f32 1.442695, %v999_v11 }
 0x1fe   : > { %v945_v63 = vpop.xlane.xlu1 %944  ;;  %v943_v16 = vpop.xlane.xlu0 %942 }
 0x1ff   : > { %2035 = vpow2.f32 %v1036_v59  ;;  %v1002_v12 = vsub.f32 %v2609_v61, %v945_v63  ;;  %v1001_v6 = vsub.f32 %v2607_v60, %v943_v16 }
 0x200   : > { %2037 = vpow2.f32 %v1034_v24  ;;  %v2024_v24 = vld [vmem:[%s3084_s5 + $0x20] sm:$0xff]  }
 0x201   : > { %v1040_v37 = vmul.f32 1.442695, %v1002_v12  ;;  %v1038_v14 = vmul.f32 1.442695, %v1001_v6 }
 0x202   : > { %v949_v26 = vpop.xlane.xlu1 %948  ;;  %v947_v42 = vpop.xlane.xlu0 %946 }
 0x203   : > { %2039 = vpow2.f32 %v1040_v37  ;;  %v1004_v53 = vsub.f32 %v2619_v19, %v949_v26  ;;  %v1003_v50 = vsub.f32 %v2617_v13, %v947_v42  ;;  %v2021_v13 = vld [vmem:[%s3084_s5 + $0x38] sm:$0xff]  }
 0x204   : > { %v2746_v15 = vpop.eup %2029  ;;  %2041 = vpow2.f32 %v1038_v14  ;;  %1921 = vmatprep.subr.bf16.mxu1 %v2021_v13 }
 0x205   : > { %v1044_v27 = vmul.f32 1.442695, %v1004_v53  ;;  %v1042_v31 = vmul.f32 1.442695, %v1003_v50  ;;  %1092 = vadd.xlane.f32.xlu1 %v2746_v15  ;;  %1922 = vmatpush3.bf16.msra.mxu1 %v2021_v13  ;;  %v2025_v50 = vld [vmem:[%s3084_s5 + $0x18] sm:$0xff]   ;;  %v2026_v13 = vld [vmem:[%s3084_s5 + $0x10] sm:$0xff]  }
 0x206   : > { %v953_v61 = vpop.xlane.xlu1 %952  ;;  %v951_v29 = vpop.xlane.xlu0 %950  ;;  %1923 = vmatprep.subr.bf16.mxu1 %v2022_v18 }
 0x207   : > { %2043 = vpow2.f32 %v1044_v27  ;;  %v1006_v60 = vsub.f32 %v2629_v32, %v953_v61  ;;  %v1005_v47 = vsub.f32 %v2627_v25, %v951_v29 }
 0x208   : > { %v2751_v22 = vpop.eup %2031  ;;  %2045 = vpow2.f32 %v1042_v31 }
 0x209   : > { %v2756_v19 = vpop.eup %2033  ;;  %v1048_v28 = vmul.f32 1.442695, %v1006_v60  ;;  %v1046_v38 = vmul.f32 1.442695, %v1005_v47  ;;  %1094 = vadd.xlane.f32.xlu0 %v2751_v22  ;;  %1924 = vmatpush3.bf16.msra.mxu1 %v2022_v18  ;;  %v2027_v18 = vld [vmem:[%s3084_s5 + $0x8] sm:$0xff]  }
 0x20a   : > { %1096 = vadd.xlane.f32.xlu1 %v2756_v19  ;;  %v957_v44 = vpop.xlane.xlu1 %956  ;;  %v955_v48 = vpop.xlane.xlu0 %954  ;;  %1925 = vmatprep.subr.bf16.mxu1 %v2023_v49 }
 0x20b   : > { %2047 = vpow2.f32 %v1048_v28  ;;  %v1008_v25 = vsub.f32 %v2639_v43, %v957_v44  ;;  %v1007_v32 = vsub.f32 %v2637_v40, %v955_v48 }
 0x20c   : > { %v2762_v1 = vpop.eup %2035  ;;  %2049 = vpow2.f32 %v1046_v38 }
 0x20d   : > { %v2767_v36 = vpop.eup %2037  ;;  %v1052_v45 = vmul.f32 1.442695, %v1008_v25  ;;  %v1050_v51 = vmul.f32 1.442695, %v1007_v32  ;;  %1926 = vmatpush3.bf16.msra.mxu1 %v2023_v49  ;;  %v2028_v49 = vld [vmem:[%s3084_s5] sm:$0xff]  }
 0x20e   : > { %1100 = vadd.xlane.f32.xlu1 %v2762_v1  ;;  %1098 = vadd.xlane.f32.xlu0 %v2767_v36  ;;  %v961_v4 = vpop.xlane.xlu1 %960  ;;  %v959_v43 = vpop.xlane.xlu0 %958 }
 0x20f   : > { %2051 = vpow2.f32 %v1052_v45  ;;  %v1010_v40 = vsub.f32 %v2649_v55, %v961_v4  ;;  %v1009_v41 = vsub.f32 %v2647_v54, %v959_v43  ;;  %1927 = vmatprep.subr.bf16.mxu1 %v2024_v24 }
 0x210   : > { %v2773_v57 = vpop.eup %2039  ;;  %2053 = vpow2.f32 %v1050_v51 }
 0x211   : > { %v2778_v52 = vpop.eup %2041  ;;  %v1056_v2 = vmul.f32 1.442695, %v1010_v40  ;;  %v1054_v58 = vmul.f32 1.442695, %v1009_v41  ;;  %1928 = vmatpush3.bf16.msra.mxu1 %v2024_v24 }
 0x212   : > { %1104 = vadd.xlane.f32.xlu1 %v2773_v57  ;;  %1102 = vadd.xlane.f32.xlu0 %v2778_v52  ;;  %v965_v55 = vpop.xlane.xlu1 %964  ;;  %v963_v62 = vpop.xlane.xlu0 %962 }
 0x213   : > { %2055 = vpow2.f32 %v1056_v2  ;;  %v1012_v54 = vsub.f32 %v2659_v8, %v965_v55  ;;  %v1011_v11 = vsub.f32 %v2657_v5, %v963_v62  ;;  %1929 = vmatprep.subr.bf16.mxu1 %v2025_v50 }
 0x214   : > { %v2784_v59 = vpop.eup %2043  ;;  %2057 = vpow2.f32 %v1054_v58 }
 0x215   : > { %v2789_v63 = vpop.eup %2045  ;;  %v1060_v16 = vmul.f32 1.442695, %v1012_v54  ;;  %v1058_v12 = vmul.f32 1.442695, %v1011_v11  ;;  %1930 = vmatpush3.bf16.msra.mxu1 %v2025_v50 }
 0x216   : > { %1108 = vadd.xlane.f32.xlu1 %v2784_v59  ;;  %1106 = vadd.xlane.f32.xlu0 %v2789_v63  ;;  %v969_v8 = vpop.xlane.xlu1 %968  ;;  %v967_v6 = vpop.xlane.xlu0 %966 }
 0x217   : > { %2059 = vpow2.f32 %v1060_v16  ;;  %v1014_v5 = vsub.f32 %v2669_v21, %v969_v8  ;;  %v1013_v37 = vsub.f32 %v2667_v20, %v967_v6  ;;  %1931 = vmatprep.subr.bf16.mxu1 %v2026_v13 }
 0x218   : > { %v2795_v14 = vpop.eup %2047  ;;  %2061 = vpow2.f32 %v1058_v12 }
 0x219   : > { %v2797_v26 = vpop.eup %2049  ;;  %v1064_v42 = vmul.f32 1.442695, %v1014_v5  ;;  %v1062_v53 = vmul.f32 1.442695, %v1013_v37  ;;  %1932 = vmatpush3.bf16.msra.mxu1 %v2026_v13 }
 0x21a   : > { %1112 = vadd.xlane.f32.xlu1 %v2795_v14  ;;  %1110 = vadd.xlane.f32.xlu0 %v2797_v26  ;;  %v973_v21 = vpop.xlane.xlu1 %972  ;;  %v971_v27 = vpop.xlane.xlu0 %970 }
 0x21b   : > { %2063 = vpow2.f32 %v1064_v42  ;;  %v1016_v20 = vsub.f32 %v2679_v34, %v973_v21  ;;  %v1015_v31 = vsub.f32 %v2677_v33, %v971_v27  ;;  %1933 = vmatprep.subr.bf16.mxu1 %v2027_v18 }
 0x21c   : > { %v2806_v61 = vpop.eup %2051  ;;  %2065 = vpow2.f32 %v1062_v53 }
 0x21d   : > { %v2808_v29 = vpop.eup %2053  ;;  %v1068_v60 = vmul.f32 1.442695, %v1016_v20  ;;  %v1066_v47 = vmul.f32 1.442695, %v1015_v31  ;;  %1934 = vmatpush3.bf16.msra.mxu1 %v2027_v18  ;;  %v2158_v18 = vld [vmem:[%s2350_s17 + $0x10] sm:$0xff] }
 0x21e   : > { %1116 = vadd.xlane.f32.xlu1 %v2806_v61  ;;  %1114 = vadd.xlane.f32.xlu0 %v2808_v29  ;;  %v977_v34 = vpop.xlane.xlu1 %976  ;;  %v975_v28 = vpop.xlane.xlu0 %974  ;;  %vm1463_vm1 = vcmp.eq.f32.partialorder %v2158_v18, -1.0  ;;  %v2174_v18 = vld [vmem:[%s2350_s17 + $0x80] sm:$0xff] }
 0x21f   : > { %2067 = vpow2.f32 %v1068_v60  ;;  %v1018_v33 = vsub.f32 %v2689_v46, %v977_v34  ;;  %v1017_v38 = vsub.f32 %v2687_v7, %v975_v28  ;;  %1935 = vmatprep.subr.bf16.mxu1 %v2028_v49 }
 0x220   : > { %v2817_v44 = vpop.eup %2055  ;;  %2069 = vpow2.f32 %v1066_v47 }
 0x221   : > { %v2819_v48 = vpop.eup %2057  ;;  %v1072_v25 = vmul.f32 1.442695, %v1018_v33  ;;  %v1070_v32 = vmul.f32 1.442695, %v1017_v38  ;;  %1936 = vmatpush3.bf16.msra.mxu1 %v2028_v49  ;;  %v2162_v49 = vld [vmem:[%s2350_s17 + $0x20] sm:$0xff] }
 0x222   : > { %1120 = vadd.xlane.f32.xlu1 %v2817_v44  ;;  %1118 = vadd.xlane.f32.xlu0 %v2819_v48  ;;  %v981_v46 = vpop.xlane.xlu1 %980  ;;  %v979_v45 = vpop.xlane.xlu0 %978  ;;  %vm1465_vm5 = vcmp.eq.f32.partialorder %v2162_v49, -1.0 }
 0x223   : > { %2071 = vpow2.f32 %v1072_v25  ;;  %v1020_v7 = vsub.f32 %v2699_v3, %v981_v46  ;;  %v1019_v51 = vsub.f32 %v2697_v56, %v979_v45  ;;  %v2157_v25 = vld [vmem:[%s2350_s17] sm:$0xff]  ;;  %v1495_v46 = vsel %vm1463_vm1, 1, %v2251_v0  ;;  %v2159_v45 = vld [vmem:[%s2350_s17 + $0x18] sm:$0xff] }
 0x224   : > { %v2828_v4 = vpop.eup %2059  ;;  %2073 = vpow2.f32 %v1070_v32  ;;  %vm1461_vm0 = vcmp.eq.f32.partialorder %v2157_v25, -1.0  ;;  %vm1464_vm2 = vcmp.eq.f32.partialorder %v2159_v45, -1.0  ;;  %v2173_v25 = vld [vmem:[%s2350_s17 + $0x88] sm:$0xff]  ;;  %vm1477_vm1 = vcmp.eq.f32.partialorder %v2174_v18, -1.0  ;;  %v2175_v45 = vld [vmem:[%s2350_s17 + $0x98] sm:$0xff] }
 0x225   : > { %v2830_v43 = vpop.eup %2061  ;;  %v1076_v40 = vmul.f32 1.442695, %v1020_v7  ;;  %v1074_v41 = vmul.f32 1.442695, %v1019_v51  ;;  %v1493_v32 = vsel %vm1461_vm0, 1, %v2251_v0  ;;  %v2160_v7 = vld [vmem:[%s2350_s17 + $0x8] sm:$0xff] }
 0x226   : > { %1124 = vadd.xlane.f32.xlu1 %v2828_v4  ;;  %1122 = vadd.xlane.f32.xlu0 %v2830_v43  ;;  %v985_v3 = vpop.xlane.xlu1 %984  ;;  %v983_v2 = vpop.xlane.xlu0 %982  ;;  %vm1462_vm3 = vcmp.eq.f32.partialorder %v2160_v7, -1.0  ;;  %v1496_v51 = vsel %vm1464_vm2, 1, %v2251_v0  ;;  %vm1478_vm0 = vcmp.eq.f32.partialorder %v2173_v25, -1.0  ;;  %vm1480_vm2 = vcmp.eq.f32.partialorder %v2175_v45, -1.0 }
 0x227   : > { %2075 = vpow2.f32 %v1076_v40  ;;  %v1022_v56 = vsub.f32 %v2709_v17, %v985_v3  ;;  %v1021_v58 = vsub.f32 %v2707_v9, %v983_v2  ;;  %v2161_v40 = vld [vmem:[%s2350_s17 + $0x28] sm:$0xff]  ;;  %v2163_v2 = vld [vmem:[%s2350_s17 + $0x38] sm:$0xff]  ;;  %v1509_v7 = vsel %vm1477_vm1, 1, %v2251_v0 }
 0x228   : > { %v2839_v55 = vpop.eup %2063  ;;  %2077 = vpow2.f32 %v1074_v41  ;;  %vm1466_vm4 = vcmp.eq.f32.partialorder %v2161_v40, -1.0  ;;  %v1494_v41 = vsel %vm1462_vm3, 1, %v2251_v0  ;;  %vm1468_vm6 = vcmp.eq.f32.partialorder %v2163_v2, -1.0 }
 0x229   : > { %v2841_v62 = vpop.eup %2065  ;;  %v1080_v54 = vmul.f32 1.442695, %v1022_v56  ;;  %v1078_v11 = vmul.f32 1.442695, %v1021_v58  ;;  %v1498_v3 = vsel %vm1466_vm4, 1, %v2251_v0  ;;  %v1497_v56 = vsel %vm1465_vm5, 1, %v2251_v0 }
 0x22a   : > { %1128 = vadd.xlane.f32.xlu1 %v2839_v55  ;;  %1126 = vadd.xlane.f32.xlu0 %v2841_v62  ;;  %v989_v24 = vpop.xlane.xlu1 %988  ;;  %v987_v16 = vpop.xlane.xlu0 %986  ;;  %v2164_v58 = vld [vmem:[%s2350_s17 + $0x30] sm:$0xff]  ;;  %v1512_v40 = vsel %vm1480_vm2, 1, %v2251_v0 }
 0x22b   : > { %2079 = vpow2.f32 %v1080_v54  ;;  %v1024_v17 = vsub.f32 %v2721_v30, %v989_v24  ;;  %v1023_v9 = vsub.f32 %v2719_v23, %v987_v16  ;;  %vm1467_vm7 = vcmp.eq.f32.partialorder %v2164_v58, -1.0  ;;  %v2166_v16 = vld [vmem:[%s2350_s17 + $0x40] sm:$0xff] }
 0x22c   : > { %v2847_v12 = vpop.eup %2067  ;;  %2081 = vpow2.f32 %v1078_v11  ;;  %v1500_v54 = vsel %vm1468_vm6, 1, %v2251_v0  ;;  %v2165_v11 = vld [vmem:[%s2350_s17 + $0x48] sm:$0xff]  ;;  %v1499_v24 = vsel %vm1467_vm7, 1, %v2251_v0  ;;  %vm1469_vm9 = vcmp.eq.f32.partialorder %v2166_v16, -1.0 }
 0x22d   : > { %v2849_v8 = vpop.eup %2069  ;;  %v1084_v6 = vmul.f32 1.442695, %v1024_v17  ;;  %v1082_v5 = vmul.f32 1.442695, %v1023_v9  ;;  %vm1470_vm8 = vcmp.eq.f32.partialorder %v2165_v11, -1.0  ;;  %v2167_v9 = vld [vmem:[%s2350_s17 + $0x58] sm:$0xff] }
 0x22e   : > { %1132 = vadd.xlane.f32.xlu1 %v2847_v12  ;;  %1130 = vadd.xlane.f32.xlu0 %v2849_v8  ;;  %v993_v37 = vpop.xlane.xlu1 %992  ;;  %v991_v42 = vpop.xlane.xlu0 %990  ;;  %v1502_v17 = vsel %vm1470_vm8, 1, %v2251_v0  ;;  %vm1472_vm10 = vcmp.eq.f32.partialorder %v2167_v9, -1.0 }
 0x22f   : > { %2083 = vpow2.f32 %v1084_v6  ;;  %v1026_v53 = vsub.f32 %v2732_v39, %v993_v37  ;;  %v1025_v30 = vsub.f32 %v2730_v35, %v991_v42  ;;  %v1501_v6 = vsel %vm1469_vm9, 1, %v2251_v0  ;;  %v2169_v42 = vld [vmem:[%s2350_s17 + $0x68] sm:$0xff] }
 0x230   : > { %v2855_v50 = vpop.eup %2071  ;;  %2085 = vpow2.f32 %v1082_v5  ;;  %v2168_v5 = vld [vmem:[%s2350_s17 + $0x50] sm:$0xff]  ;;  %v1504_v37 = vsel %vm1472_vm10, 1, %v2251_v0  ;;  %vm1474_vm12 = vcmp.eq.f32.partialorder %v2169_v42, -1.0 }
 0x231   : > { %v2857_v23 = vpop.eup %2073  ;;  %v1088_v21 = vmul.f32 1.442695, %v1026_v53  ;;  %v1086_v27 = vmul.f32 1.442695, %v1025_v30  ;;  %vm1471_vm11 = vcmp.eq.f32.partialorder %v2168_v5, -1.0  ;;  %v2170_v30 = vld [vmem:[%s2350_s17 + $0x60] sm:$0xff] }
 0x232   : > { %1136 = vadd.xlane.f32.xlu1 %v2855_v50  ;;  %1134 = vadd.xlane.f32.xlu0 %v2857_v23  ;;  %v995_v20 = vpop.xlane.xlu0 %994  ;;  %v1503_v53 = vsel %vm1471_vm11, 1, %v2251_v0  ;;  %vm1473_vm13 = vcmp.eq.f32.partialorder %v2170_v30, -1.0 }
 0x233   : > { %2087 = vpow2.f32 %v1088_v21  ;;  %v1027_v31 = vsub.f32 %v2728_v10, %v995_v20  ;;  %v1506_v21 = vsel %vm1474_vm12, 1, %v2251_v0  ;;  %v1505_v20 = vsel %vm1473_vm13, 1, %v2251_v0 }
 0x234   : > { %v2862_v60 = vpop.eup %2075  ;;  %2089 = vpow2.f32 %v1086_v27  ;;  %v2171_v27 = vld [vmem:[%s2350_s17 + $0x78] sm:$0xff] }
 0x235   : > { %v2864_v39 = vpop.eup %2077  ;;  %v1090_v35 = vmul.f32 1.442695, %v1027_v31  ;;  %vm1476_vm14 = vcmp.eq.f32.partialorder %v2171_v27, -1.0  ;;  %v2172_v31 = vld [vmem:[%s2350_s17 + $0x70] sm:$0xff] }
 0x236   : > { %1140 = vadd.xlane.f32.xlu1 %v2862_v60  ;;  %1138 = vadd.xlane.f32.xlu0 %v2864_v39  ;;  %vm1475_vm15 = vcmp.eq.f32.partialorder %v2172_v31, -1.0 }
 0x237   : > { %2091 = vpow2.f32 %v1090_v35  ;;  %v1508_v35 = vsel %vm1476_vm14, 1, %v2251_v0 }
 0x238   : > { %v2868_v47 = vpop.eup %2079 }
 0x239   : > { %v2870_v13 = vpop.eup %2081 }
 0x23a   : > { %1144 = vadd.xlane.f32.xlu1 %v2868_v47  ;;  %1142 = vadd.xlane.f32.xlu0 %v2870_v13 }
 0x23c   : > { %v2874_v10 = vpop.eup %2083 }
 0x23d   : > { %v2876_v34 = vpop.eup %2085 }
 0x23e   : > { %1148 = vadd.xlane.f32.xlu1 %v2874_v10  ;;  %1146 = vadd.xlane.f32.xlu0 %v2876_v34 }
 0x240   : > { %v2880_v28 = vpop.eup %2087 }
 0x241   : > { %v2882_v33 = vpop.eup %2089 }
 0x242   : > { %1152 = vadd.xlane.f32.xlu1 %v2880_v28  ;;  %1150 = vadd.xlane.f32.xlu0 %v2882_v33 }
 0x244   : > { %v2886_v38 = vpop.eup %2091 }
 0x246   : > { %1154 = vadd.xlane.f32.xlu0 %v2886_v38 }
 0x253   : > { %1526 = vperm.xlu1 %2012, %v1493_v32   ;;  %v1507_v32 = vsel %vm1475_vm15, 1, %v2251_v0 }
 0x257   : > { %1532 = vperm.xlu1 %2012, %v1495_v46   ;;  %v1510_v46 = vsel %vm1478_vm0, 1, %v2251_v0 }
 0x25b   : > { %1535 = vperm.xlu1 %2012, %v1496_v51   ;;  %v2176_v51 = vld [vmem:[%s2350_s17 + $0x90] sm:$0xff] }
 0x25c   : > { %1529 = vperm.xlu0 %2011, %v1494_v41   ;;  %vm1479_vm3 = vcmp.eq.f32.partialorder %v2176_v51, -1.0  ;;  %v2177_v41 = vld [vmem:[%s2350_s17 + $0xa8] sm:$0xff] }
 0x25d   : > { %vm1482_vm4 = vcmp.eq.f32.partialorder %v2177_v41, -1.0  ;;  %v1511_v49 = vsel %vm1479_vm3, 1, %v2251_v0 }
 0x25e   : > { %v1514_v2 = vsel %vm1482_vm4, 1, %v2251_v0 }
 0x25f   : > { %1541 = vperm.xlu1 %2012, %v1498_v3   ;;  %v2178_v3 = vld [vmem:[%s2350_s17 + $0xa0] sm:$0xff] }
 0x260   : > { %1538 = vperm.xlu0 %2011, %v1497_v56   ;;  %vm1481_vm5 = vcmp.eq.f32.partialorder %v2178_v3, -1.0  ;;  %v2179_v56 = vld [vmem:[%s2350_s17 + $0xb8] sm:$0xff] }
 0x261   : > { %vm1484_vm6 = vcmp.eq.f32.partialorder %v2179_v56, -1.0  ;;  %v1513_v58 = vsel %vm1481_vm5, 1, %v2251_v0 }
 0x262   : > { %v1516_v11 = vsel %vm1484_vm6, 1, %v2251_v0 }
 0x263   : > { %1547 = vperm.xlu1 %2012, %v1500_v54   ;;  %v2180_v54 = vld [vmem:[%s2350_s17 + $0xb0] sm:$0xff] }
 0x264   : > { %1544 = vperm.xlu0 %2011, %v1499_v24   ;;  %vm1483_vm7 = vcmp.eq.f32.partialorder %v2180_v54, -1.0  ;;  %v2181_v24 = vld [vmem:[%s2350_s17 + $0xc8] sm:$0xff] }
 0x265   : > { %vm1486_vm8 = vcmp.eq.f32.partialorder %v2181_v24, -1.0  ;;  %v1515_v16 = vsel %vm1483_vm7, 1, %v2251_v0 }
 0x266   : > { %v1518_v9 = vsel %vm1486_vm8, 1, %v2251_v0 }
 0x267   : > { %1553 = vperm.xlu1 %2012, %v1502_v17   ;;  %v2182_v17 = vld [vmem:[%s2350_s17 + $0xc0] sm:$0xff] }
 0x268   : > { %1550 = vperm.xlu0 %2011, %v1501_v6   ;;  %vm1485_vm9 = vcmp.eq.f32.partialorder %v2182_v17, -1.0  ;;  %v2183_v6 = vld [vmem:[%s2350_s17 + $0xd8] sm:$0xff] }
 0x269   : > { %vm1488_vm10 = vcmp.eq.f32.partialorder %v2183_v6, -1.0  ;;  %v1517_v5 = vsel %vm1485_vm9, 1, %v2251_v0 }
 0x26a   : > { %v1520_v42 = vsel %vm1488_vm10, 1, %v2251_v0 }
 0x26b   : > { %1559 = vperm.xlu1 %2012, %v1504_v37   ;;  %v2184_v37 = vld [vmem:[%s2350_s17 + $0xd0] sm:$0xff] }
 0x26c   : > { %1556 = vperm.xlu0 %2011, %v1503_v53   ;;  %vm1487_vm11 = vcmp.eq.f32.partialorder %v2184_v37, -1.0  ;;  %v2185_v53 = vld [vmem:[%s2350_s17 + $0xe8] sm:$0xff] }
 0x26d   : > { %vm1490_vm12 = vcmp.eq.f32.partialorder %v2185_v53, -1.0  ;;  %v1519_v30 = vsel %vm1487_vm11, 1, %v2251_v0 }
 0x26e   : > { %v1522_v27 = vsel %vm1490_vm12, 1, %v2251_v0 }
 0x26f   : > { %1565 = vperm.xlu1 %2012, %v1506_v21   ;;  %v2186_v21 = vld [vmem:[%s2350_s17 + $0xe0] sm:$0xff] }
 0x270   : > { %1562 = vperm.xlu0 %2011, %v1505_v20   ;;  %vm1489_vm13 = vcmp.eq.f32.partialorder %v2186_v21, -1.0  ;;  %v2187_v20 = vld [vmem:[%s2350_s17 + $0xf8] sm:$0xff] }
 0x271   : > { %vm1492_vm14 = vcmp.eq.f32.partialorder %v2187_v20, -1.0  ;;  %v1521_v31 = vsel %vm1489_vm13, 1, %v2251_v0 }
 0x273   : > { %1571 = vperm.xlu1 %2012, %v1508_v35   ;;  %v2188_v35 = vld [vmem:[%s2350_s17 + $0xf0] sm:$0xff]  ;;  %s243_s17 = sand.u32 1, %s2241_s22  }
 0x274   : > { %1568 = vperm.xlu0 %2011, %v1507_v32   ;;  %vm1491_vm15 = vcmp.eq.f32.partialorder %v2188_v35, -1.0  ;;  %v1524_v32 = vsel %vm1492_vm14, 1, %v2251_v0  ;;  %s1797_s9 = sshll.u32 %s243_s17, 8  ;;  %s3039_s25 = scalar_lea.sflag [#allocation3], %s243_s17 }
 0x275   : > { %v1523_v18 = vsel %vm1491_vm15, 1, %v2251_v0  ;;  %s2990_s10 = scalar_lea.vmem [#allocation2], %s1797_s9 }
 0x276   : > { %s1731_s12 = sshll.u32 %s2990_s10, 4  ;;  %s3033_s12 = int_to_ptr.vmem [resolvable:$true] %s1731_s12 }
 0x277   : > { %1577 = vperm.xlu1 %2012, %v1510_v46   ;;  %s2189_s16 = scalar_lea.vmem %s3033_s12, 4096  ;;  %p2196_p0 = scmp.lt.s32.totalorder %s3033_s12, %s2194_s19 }
 0x278   : > { %1574 = vperm.xlu0 %2011, %v1509_v7   ;;  %p2190_p11 = scmp.ne.s32.totalorder %s3033_s12, %s2189_s16  ;;  %p2197_p1 = scmp.lt.s32.totalorder %s2195_s20, %s2189_s16 }
 0x27a   : > { %p2191_p12 = pnand %p2190_p11, %p2328_p5  ;;  %p2198_p2 = por %p2197_p1, %p2196_p0 }
 0x27b   : > { %1583 = vperm.xlu1 %2012, %v1512_v40  }
 0x27c   : > { %1580 = vperm.xlu0 %2011, %v1511_v49   ;;  %p2192_p13 = pneg %p2191_p12 }
 0x27e   : > { %p2199_p3 = pnand %p2198_p2, %p2192_p13 }
 0x27f   : > { %1589 = vperm.xlu1 %2012, %v1514_v2  }
 0x280   : > { %1586 = vperm.xlu0 %2011, %v1513_v58  }
 0x283   : > { %1595 = vperm.xlu1 %2012, %v1516_v11  }
 0x284   : > { %1592 = vperm.xlu0 %2011, %v1515_v16  }
 0x287   : > { %1601 = vperm.xlu1 %2012, %v1518_v9  }
 0x288   : > { %1598 = vperm.xlu0 %2011, %v1517_v5  }
 0x28b   : > { %1607 = vperm.xlu1 %2012, %v1520_v42  }
 0x28c   : > { %1604 = vperm.xlu0 %2011, %v1519_v30  }
 0x28e   : > { %v1093_v25 = vpop.xlane.xlu1 %1092 }
 0x28f   : > { %1613 = vperm.xlu1 %2012, %v1522_v27   ;;  %2093 = vrcp.f32 %v1093_v25 }
 0x290   : > { %1610 = vperm.xlu0 %2011, %v1521_v31  }
 0x292   : > { %v1095_v46 = vpop.xlane.xlu0 %1094 }
 0x293   : > { %v1097_v45 = vpop.xlane.xlu1 %1096  ;;  %2095 = vrcp.f32 %v1095_v46  ;;  %1619 = vperm.xlu1 %2012, %v1524_v32  }
 0x294   : > { %1616 = vperm.xlu0 %2011, %v1523_v18   ;;  %2097 = vrcp.f32 %v1097_v45 }
 0x297   : > { %v1101_v7 = vpop.xlane.xlu1 %1100  ;;  %v1099_v51 = vpop.xlane.xlu0 %1098 }
 0x298   : > { %2099 = vrcp.f32 %v1099_v51 }
 0x299   : > { %2101 = vrcp.f32 %v1101_v7 }
 0x29b   : > { %v1105_v40 = vpop.xlane.xlu1 %1104  ;;  %v1103_v41 = vpop.xlane.xlu0 %1102 }
 0x29c   : > { %2103 = vrcp.f32 %v1103_v41  ;;  %v2094_v49 = vpop.eup %2093 }
 0x29d   : > { %2105 = vrcp.f32 %v1105_v40  ;;  %v1188_v0 = vmul.f32 %v2094_v49, %v2746_v15 }
 0x29f   : > { %v1109_v3 = vpop.xlane.xlu1 %1108  ;;  %v1107_v2 = vpop.xlane.xlu0 %1106 }
 0x2a0   : > { %v2096_v56 = vpop.eup %2095  ;;  %2107 = vrcp.f32 %v1107_v2 }
 0x2a1   : > { %v1189_v58 = vmul.f32 %v2096_v56, %v2751_v22  ;;  %2109 = vrcp.f32 %v1109_v3  ;;  %v2098_v16 = vpop.eup %2097 }
 0x2a2   : > { %v1190_v5 = vmul.f32 %v2098_v16, %v2756_v19 }
 0x2a3   : > { %v1113_v54 = vpop.xlane.xlu1 %1112  ;;  %v1111_v11 = vpop.xlane.xlu0 %1110  ;;  %v1220_v24 = vpack.c.bf16 %v1189_v58, %v1188_v0 }
 0x2a4   : > { %2111 = vrcp.f32 %v1111_v11 }
 0x2a5   : > { %1937 = vmatprep.mubr.bf16.mxu1 %v1220_v24  ;;  %v2100_v17 = vpop.eup %2099  ;;  %2113 = vrcp.f32 %v1113_v54 }
 0x2a6   : > { %v1191_v37 = vmul.f32 %v2100_v17, %v2767_v36  ;;  %v2102_v42 = vpop.eup %2101 }
 0x2a7   : > { %v1117_v9 = vpop.xlane.xlu1 %1116  ;;  %v1115_v6 = vpop.xlane.xlu0 %1114  ;;  %v1192_v21 = vmul.f32 %v2102_v42, %v2762_v1 }
 0x2a8   : > { %2115 = vrcp.f32 %v1115_v6  ;;  %v1221_v15 = vpack.c.bf16 %v1191_v37, %v1190_v5 }
 0x2a9   : > { %v2104_v53 = vpop.eup %2103  ;;  %2117 = vrcp.f32 %v1117_v9 }
 0x2aa   : > { %1938 = vmatmul.mubr.bf16.vlgmr.msra.gmra.mxu1 %v1221_v15  ;;  %v1193_v27 = vmul.f32 %v2104_v53, %v2778_v52  ;;  %v2106_v20 = vpop.eup %2105 }
 0x2ab   : > { %v1121_v22 = vpop.xlane.xlu1 %1120  ;;  %v1119_v30 = vpop.xlane.xlu0 %1118  ;;  %v1194_v25 = vmul.f32 %v2106_v20, %v2773_v57 }
 0x2ac   : > { %2119 = vrcp.f32 %v1119_v30  ;;  %v1222_v31 = vpack.c.bf16 %v1193_v27, %v1192_v21 }
 0x2ad   : > { %v2108_v35 = vpop.eup %2107  ;;  %2121 = vrcp.f32 %v1121_v22 }
 0x2ae   : > { %1941 = vmatprep.mubr.bf16.mxu1 %v1222_v31  ;;  %v1195_v32 = vmul.f32 %v2108_v35, %v2789_v63  ;;  %v2110_v18 = vpop.eup %2109 }
 0x2af   : > { %v1125_v19 = vpop.xlane.xlu1 %1124  ;;  %v1123_v36 = vpop.xlane.xlu0 %1122  ;;  %v1196_v7 = vmul.f32 %v2110_v18, %v2784_v59 }
 0x2b0   : > { %2123 = vrcp.f32 %v1123_v36  ;;  %v1223_v46 = vpack.c.bf16 %v1195_v32, %v1194_v25 }
 0x2b1   : > { %v2112_v45 = vpop.eup %2111  ;;  %2125 = vrcp.f32 %v1125_v19 }
 0x2b2   : > { %1942 = vmatmul.mubr.bf16.gmra.mxu1 %v1223_v46  ;;  %v1197_v51 = vmul.f32 %v2112_v45, %v2797_v26  ;;  %v2114_v40 = vpop.eup %2113 }
 0x2b3   : > { %v1129_v1 = vpop.xlane.xlu1 %1128  ;;  %v1127_v52 = vpop.xlane.xlu0 %1126  ;;  %v1198_v3 = vmul.f32 %v2114_v40, %v2795_v14 }
 0x2b4   : > { %2127 = vrcp.f32 %v1127_v52  ;;  %v1224_v41 = vpack.c.bf16 %v1197_v51, %v1196_v7 }
 0x2b5   : > { %v2116_v49 = vpop.eup %2115  ;;  %2129 = vrcp.f32 %v1129_v1 }
 0x2b6   : > { %1945 = vmatprep.mubr.bf16.mxu1 %v1224_v41  ;;  %v1199_v2 = vmul.f32 %v2116_v49, %v2808_v29  ;;  %v2118_v56 = vpop.eup %2117 }
 0x2b7   : > { %v1133_v57 = vpop.xlane.xlu1 %1132  ;;  %v1131_v63 = vpop.xlane.xlu0 %1130  ;;  %v1200_v54 = vmul.f32 %v2118_v56, %v2806_v61 }
 0x2b8   : > { %2131 = vrcp.f32 %v1131_v63  ;;  %v1225_v0 = vpack.c.bf16 %v1199_v2, %v1198_v3 }
 0x2b9   : > { %v2120_v58 = vpop.eup %2119  ;;  %2133 = vrcp.f32 %v1133_v57 }
 0x2ba   : > { %1946 = vmatmul.mubr.bf16.gmra.mxu1 %v1225_v0  ;;  %v1201_v11 = vmul.f32 %v2120_v58, %v2819_v48  ;;  %v2122_v24 = vpop.eup %2121 }
 0x2bb   : > { %v1137_v59 = vpop.xlane.xlu1 %1136  ;;  %v1135_v26 = vpop.xlane.xlu0 %1134  ;;  %v1202_v9 = vmul.f32 %v2122_v24, %v2817_v44 }
 0x2bc   : > { %2135 = vrcp.f32 %v1135_v26  ;;  %v1226_v16 = vpack.c.bf16 %v1201_v11, %v1200_v54 }
 0x2bd   : > { %v2124_v17 = vpop.eup %2123  ;;  %2137 = vrcp.f32 %v1137_v59 }
 0x2be   : > { %1949 = vmatprep.mubr.bf16.mxu1 %v1226_v16  ;;  %v1203_v6 = vmul.f32 %v2124_v17, %v2830_v43  ;;  %v2126_v5 = vpop.eup %2125 }
 0x2bf   : > { %v1141_v14 = vpop.xlane.xlu1 %1140  ;;  %v1139_v29 = vpop.xlane.xlu0 %1138  ;;  %v1204_v15 = vmul.f32 %v2126_v5, %v2828_v4 }
 0x2c0   : > { %2139 = vrcp.f32 %v1139_v29  ;;  %v1227_v37 = vpack.c.bf16 %v1203_v6, %v1202_v9 }
 0x2c1   : > { %v2128_v42 = vpop.eup %2127  ;;  %2141 = vrcp.f32 %v1141_v14 }
 0x2c2   : > { %1950 = vmatmul.mubr.bf16.gmra.mxu1 %v1227_v37  ;;  %v1205_v53 = vmul.f32 %v2128_v42, %v2841_v62  ;;  %v2130_v22 = vpop.eup %2129 }
 0x2c3   : > { %v1145_v61 = vpop.xlane.xlu1 %1144  ;;  %v1143_v48 = vpop.xlane.xlu0 %1142  ;;  %v1206_v27 = vmul.f32 %v2130_v22, %v2839_v55 }
 0x2c4   : > { %2143 = vrcp.f32 %v1143_v48  ;;  %v1228_v30 = vpack.c.bf16 %v1205_v53, %v1204_v15 }
 0x2c5   : > { %v2132_v21 = vpop.eup %2131  ;;  %2145 = vrcp.f32 %v1145_v61 }
 0x2c6   : > { %1953 = vmatprep.mubr.bf16.mxu1 %v1228_v30  ;;  %v1207_v20 = vmul.f32 %v2132_v21, %v2849_v8  ;;  %v2134_v31 = vpop.eup %2133 }
 0x2c7   : > { %v1149_v44 = vpop.xlane.xlu1 %1148  ;;  %v1147_v43 = vpop.xlane.xlu0 %1146  ;;  %v1208_v36 = vmul.f32 %v2134_v31, %v2847_v12 }
 0x2c8   : > { %2147 = vrcp.f32 %v1147_v43  ;;  %v1229_v35 = vpack.c.bf16 %v1207_v20, %v1206_v27 }
 0x2c9   : > { %v2136_v19 = vpop.eup %2135  ;;  %2149 = vrcp.f32 %v1149_v44 }
 0x2ca   : > { %1954 = vmatmul.mubr.bf16.gmra.mxu1 %v1229_v35  ;;  %v1209_v25 = vmul.f32 %v2136_v19, %v2857_v23  ;;  %v2138_v32 = vpop.eup %2137 }
 0x2cb   : > { %v1153_v4 = vpop.xlane.xlu1 %1152  ;;  %v1151_v62 = vpop.xlane.xlu0 %1150  ;;  %v1210_v8 = vmul.f32 %v2138_v32, %v2855_v50 }
 0x2cc   : > { %2151 = vrcp.f32 %v1151_v62  ;;  %v1230_v18 = vpack.c.bf16 %v1209_v25, %v1208_v36 }
 0x2cd   : > { %v2140_v46 = vpop.eup %2139  ;;  %2153 = vrcp.f32 %v1153_v4 }
 0x2ce   : > { %1957 = vmatprep.mubr.bf16.mxu1 %v1230_v18  ;;  %v1211_v45 = vmul.f32 %v2140_v46, %v2864_v39  ;;  %v2142_v1 = vpop.eup %2141 }
 0x2cf   : > { %v1155_v55 = vpop.xlane.xlu0 %1154  ;;  %v1212_v12 = vmul.f32 %v2142_v1, %v2862_v60 }
 0x2d0   : > { %2155 = vrcp.f32 %v1155_v55  ;;  %v1231_v52 = vpack.c.bf16 %v1211_v45, %v1210_v8 }
 0x2d1   : > { %v2144_v7 = vpop.eup %2143 }
 0x2d2   : > { %1958 = vmatmul.mubr.bf16.gmra.mxu1 %v1231_v52  ;;  %v1213_v23 = vmul.f32 %v2144_v7, %v2870_v13  ;;  %v2146_v51 = vpop.eup %2145 }
 0x2d3   : > { %v1214_v49 = vmul.f32 %v2146_v51, %v2868_v47 }
 0x2d4   : > { %v1232_v40 = vpack.c.bf16 %v1213_v23, %v1212_v12 }
 0x2d5   : > { %v2148_v41 = vpop.eup %2147 }
 0x2d6   : > { %1961 = vmatprep.mubr.bf16.mxu1 %v1232_v40  ;;  %v1215_v57 = vmul.f32 %v2148_v41, %v2876_v34  ;;  %v2150_v50 = vpop.eup %2149  ;;  %v1527_v34 = vpop.permute.xlu1 %1526 }
 0x2d7   : > { %v1216_v2 = vmul.f32 %v2150_v50, %v2874_v10  ;;  %v1530_v26 = vpop.permute.xlu0 %1529  ;;  %vm1621_vm1 = vcmp.eq.s32.totalorder %v1527_v34, 1 }
 0x2d8   : > { %v1233_v63 = vpack.c.bf16 %v1215_v57, %v1214_v49  ;;  %vm1622_vm3 = vcmp.eq.s32.totalorder %v1530_v26, 1 }
 0x2d9   : > { %v2152_v39 = vpop.eup %2151 }
 0x2da   : > { %v2154_v3 = vpop.eup %2153  ;;  %1962 = vmatmul.mubr.bf16.gmra.mxu1 %v1233_v63  ;;  %v1217_v56 = vmul.f32 %v2152_v39, %v2882_v33  ;;  %v1533_v59 = vpop.permute.xlu1 %1532 }
 0x2db   : > { %v1218_v13 = vmul.f32 %v2154_v3, %v2880_v28  ;;  %v1539_v11 = vpop.permute.xlu0 %1538  ;;  %vm1623_vm0 = vcmp.eq.s32.totalorder %v1533_v59, 1 }
 0x2dc   : > { %v1234_v0 = vpack.c.bf16 %v1217_v56, %v1216_v2  ;;  %vm1625_vm5 = vcmp.eq.s32.totalorder %v1539_v11, 1 }
 0x2dd   : > { %v2156_v60 = vpop.eup %2155 }
 0x2de   : > { %v1219_v58 = vmul.f32 %v2156_v60, %v2886_v38  ;;  %1965 = vmatprep.mubr.bf16.mxu1 %v1234_v0  ;;  %v1536_v54 = vpop.permute.xlu1 %1535 }
 0x2df   : > { %v1545_v10 = vpop.permute.xlu0 %1544  ;;  %vm1624_vm2 = vcmp.eq.s32.totalorder %v1536_v54, 1 }
 0x2e0   : > { %v1235_v47 = vpack.c.bf16 %v1219_v58, %v1218_v13  ;;  %vm1627_vm4 = vcmp.eq.s32.totalorder %v1545_v10, 1 }
 0x2e2   : > { %1966 = vmatmul.mubr.bf16.gmra.mxu1 %v1235_v47  ;;  %v1542_v24 = vpop.permute.xlu1 %1541 }
 0x2e3   : > { %v1551_v33 = vpop.permute.xlu0 %1550  ;;  %vm1626_vm7 = vcmp.eq.s32.totalorder %v1542_v24, 1 }
 0x2e4   : > { %vm1629_vm9 = vcmp.eq.s32.totalorder %v1551_v33, 1 }
 0x2e6   : > { %v1548_v16 = vpop.permute.xlu1 %1547 }
 0x2e7   : > { %v1557_v14 = vpop.permute.xlu0 %1556  ;;  %vm1628_vm6 = vcmp.eq.s32.totalorder %v1548_v16, 1 }
 0x2e8   : > { %vm1631_vm8 = vcmp.eq.s32.totalorder %v1557_v14, 1 }
 0x2ea   : > { %v1554_v17 = vpop.permute.xlu1 %1553 }
 0x2eb   : > { %v2988_v38 = vpop.permute.xlu0 %1562  ;;  %vm1630_vm11 = vcmp.eq.s32.totalorder %v1554_v17, 1 }
 0x2ec   : > { %vm1633_vm13 = vcmp.eq.s32.totalorder %v2988_v38, 1 }
 0x2ee   : > { %v1560_v28 = vpop.permute.xlu1 %1559 }
 0x2ef   : > { %v1569_v61 = vpop.permute.xlu0 %1568  ;;  %vm1632_vm10 = vcmp.eq.s32.totalorder %v1560_v28, 1 }
 0x2f0   : > { %vm1635_vm12 = vcmp.eq.s32.totalorder %v1569_v61, 1 }
 0x2f2   : > { %v2993_v5 = vpop.permute.xlu1 %1565 }
 0x2f3   : > { %v1575_v43 = vpop.permute.xlu0 %1574  ;;  %vm1634_vm15 = vcmp.eq.s32.totalorder %v2993_v5, 1 }
 0x2f6   : > { %v1572_v30 = vpop.permute.xlu1 %1571 }
 0x2f7   : > { %v1581_v36 = vpop.permute.xlu0 %1580  ;;  %vm1636_vm14 = vcmp.eq.s32.totalorder %v1572_v30, 1 }
 0x2fa   : > { %v1578_v19 = vpop.permute.xlu1 %1577 }
 0x2fb   : > { %v1587_v1 = vpop.permute.xlu0 %1586 }
 0x2fe   : > { %v1584_v55 = vpop.permute.xlu1 %1583 }
 0x2ff   : > { %v1593_v49 = vpop.permute.xlu0 %1592 }
 0x302   : > { %v1590_v51 = vpop.permute.xlu1 %1589 }
 0x303   : > { %v1599_v60 = vpop.permute.xlu0 %1598 }
 0x306   : > { %v1596_v3 = vpop.permute.xlu1 %1595 }
 0x307   : > { %v1605_v54 = vpop.permute.xlu0 %1604 }
 0x30a   : > { %v1602_v34 = vpop.permute.xlu1 %1601 }
 0x30b   : > { %v1611_v28 = vpop.permute.xlu0 %1610 }
 0x30e   : > { %v1608_v33 = vpop.permute.xlu1 %1607 }
 0x30f   : > { %v1617_v61 = vpop.permute.xlu0 %1616 }
 0x312   : > { %v1614_v5 = vpop.permute.xlu1 %1613 }
 0x316   : > { %v1620_v30 = vpop.permute.xlu1 %1619 }
 0x36a   : > { %v1939_v29 = vpop.f32.mrf.mxu1 }
 0x36b   : > { %v1655_v9 = vsel %vm1623_vm0, 0.0, %v1939_v29  ;;  %vm1639_vm0 = vcmp.eq.s32.totalorder %v1581_v36, 1 }
 0x36c   : > { %1687 = vst [vmem:[%s2990_s10 + $0x10] sm:$0xff] %v1655_v9  ;;  %v1334_v6 = vpop.f32.mrf.mxu1 }
 0x36d   : > { %v1653_v37 = vsel %vm1621_vm1, 0.0, %v1334_v6  ;;  %vm1637_vm1 = vcmp.eq.s32.totalorder %v1575_v43, 1 }
 0x36e   : > { %1685 = vst [vmem:[%s2990_s10] sm:$0xff] %v1653_v37  ;;  %v1940_v42 = vpop.f32.mrf.mxu1 }
 0x36f   : > { %v1656_v48 = vsel %vm1624_vm2, 0.0, %v1940_v42  ;;  %vm1640_vm2 = vcmp.eq.s32.totalorder %v1584_v55, 1 }
 0x370   : > { %1688 = vst [vmem:[%s2990_s10 + $0x18] sm:$0xff] %v1656_v48  ;;  %v1337_v15 = vpop.f32.mrf.mxu1 }
 0x371   : > { %v1654_v53 = vsel %vm1622_vm3, 0.0, %v1337_v15  ;;  %vm1638_vm3 = vcmp.eq.s32.totalorder %v1578_v19, 1 }
 0x372   : > { %1686 = vst [vmem:[%s2990_s10 + $0x8] sm:$0xff] %v1654_v53  ;;  %v1943_v22 = vpop.f32.mrf.mxu1 }
 0x373   : > { %v1659_v21 = vsel %vm1627_vm4, 0.0, %v1943_v22  ;;  %vm1643_vm4 = vcmp.eq.s32.totalorder %v1593_v49, 1 }
 0x374   : > { %1691 = vst [vmem:[%s2990_s10 + $0x30] sm:$0xff] %v1659_v21  ;;  %v1350_v44 = vpop.f32.mrf.mxu1 }
 0x375   : > { %v1657_v27 = vsel %vm1625_vm5, 0.0, %v1350_v44  ;;  %vm1641_vm5 = vcmp.eq.s32.totalorder %v1587_v1, 1 }
 0x376   : > { %1689 = vst [vmem:[%s2990_s10 + $0x20] sm:$0xff] %v1657_v27  ;;  %v1944_v20 = vpop.f32.mrf.mxu1 }
 0x377   : > { %v1660_v31 = vsel %vm1628_vm6, 0.0, %v1944_v20  ;;  %vm1644_vm6 = vcmp.eq.s32.totalorder %v1596_v3, 1 }
 0x378   : > { %1692 = vst [vmem:[%s2990_s10 + $0x38] sm:$0xff] %v1660_v31  ;;  %v1353_v35 = vpop.f32.mrf.mxu1 }
 0x379   : > { %v1658_v4 = vsel %vm1626_vm7, 0.0, %v1353_v35  ;;  %vm1642_vm7 = vcmp.eq.s32.totalorder %v1590_v51, 1 }
 0x37a   : > { %1690 = vst [vmem:[%s2990_s10 + $0x28] sm:$0xff] %v1658_v4  ;;  %v1947_v62 = vpop.f32.mrf.mxu1 }
 0x37b   : > { %v1663_v25 = vsel %vm1631_vm8, 0.0, %v1947_v62  ;;  %vm1647_vm8 = vcmp.eq.s32.totalorder %v1605_v54, 1 }
 0x37c   : > { %1695 = vst [vmem:[%s2990_s10 + $0x50] sm:$0xff] %v1663_v25  ;;  %v1366_v32 = vpop.f32.mrf.mxu1 }
 0x37d   : > { %v1661_v18 = vsel %vm1629_vm9, 0.0, %v1366_v32  ;;  %vm1645_vm9 = vcmp.eq.s32.totalorder %v1599_v60, 1 }
 0x37e   : > { %1693 = vst [vmem:[%s2990_s10 + $0x40] sm:$0xff] %v1661_v18  ;;  %v1948_v46 = vpop.f32.mrf.mxu1 }
 0x37f   : > { %v1664_v8 = vsel %vm1632_vm10, 0.0, %v1948_v46  ;;  %vm1648_vm10 = vcmp.eq.s32.totalorder %v1608_v33, 1 }
 0x380   : > { %1696 = vst [vmem:[%s2990_s10 + $0x58] sm:$0xff] %v1664_v8  ;;  %v1369_v45 = vpop.f32.mrf.mxu1 }
 0x381   : > { %v1662_v52 = vsel %vm1630_vm11, 0.0, %v1369_v45  ;;  %vm1646_vm11 = vcmp.eq.s32.totalorder %v1602_v34, 1 }
 0x382   : > { %1694 = vst [vmem:[%s2990_s10 + $0x48] sm:$0xff] %v1662_v52  ;;  %v1951_v7 = vpop.f32.mrf.mxu1 }
 0x383   : > { %v1667_v12 = vsel %vm1635_vm12, 0.0, %v1951_v7  ;;  %vm1651_vm12 = vcmp.eq.s32.totalorder %v1617_v61, 1 }
 0x384   : > { %1699 = vst [vmem:[%s2990_s10 + $0x70] sm:$0xff] %v1667_v12  ;;  %v1382_v23 = vpop.f32.mrf.mxu1 }
 0x385   : > { %v1665_v40 = vsel %vm1633_vm13, 0.0, %v1382_v23  ;;  %vm1649_vm13 = vcmp.eq.s32.totalorder %v1611_v28, 1 }
 0x386   : > { %1697 = vst [vmem:[%s2990_s10 + $0x60] sm:$0xff] %v1665_v40  ;;  %v1952_v41 = vpop.f32.mrf.mxu1 }
 0x387   : > { %v1668_v57 = vsel %vm1636_vm14, 0.0, %v1952_v41  ;;  %vm1652_vm14 = vcmp.eq.s32.totalorder %v1620_v30, 1 }
 0x388   : > { %1700 = vst [vmem:[%s2990_s10 + $0x78] sm:$0xff] %v1668_v57  ;;  %v1385_v50 = vpop.f32.mrf.mxu1 }
 0x389   : > { %v1666_v63 = vsel %vm1634_vm15, 0.0, %v1385_v50  ;;  %vm1650_vm15 = vcmp.eq.s32.totalorder %v1614_v5, 1 }
 0x38a   : > { %1698 = vst [vmem:[%s2990_s10 + $0x68] sm:$0xff] %v1666_v63  ;;  %v1955_v39 = vpop.f32.mrf.mxu1 }
 0x38b   : > { %v1671_v2 = vsel %vm1639_vm0, 0.0, %v1955_v39 }
 0x38c   : > { %1703 = vst [vmem:[%s2990_s10 + $0x90] sm:$0xff] %v1671_v2  ;;  %v1398_v56 = vpop.f32.mrf.mxu1 }
 0x38d   : > { %v1669_v0 = vsel %vm1637_vm1, 0.0, %v1398_v56 }
 0x38e   : > { %1701 = vst [vmem:[%s2990_s10 + $0x80] sm:$0xff] %v1669_v0  ;;  %v1956_v13 = vpop.f32.mrf.mxu1 }
 0x38f   : > { %v1672_v58 = vsel %vm1640_vm2, 0.0, %v1956_v13 }
 0x390   : > { %1704 = vst [vmem:[%s2990_s10 + $0x98] sm:$0xff] %v1672_v58  ;;  %v1401_v47 = vpop.f32.mrf.mxu1 }
 0x391   : > { %v1670_v59 = vsel %vm1638_vm3, 0.0, %v1401_v47 }
 0x392   : > { %1702 = vst [vmem:[%s2990_s10 + $0x88] sm:$0xff] %v1670_v59  ;;  %v1959_v26 = vpop.f32.mrf.mxu1 }
 0x393   : > { %v1675_v11 = vsel %vm1643_vm4, 0.0, %v1959_v26 }
 0x394   : > { %1707 = vst [vmem:[%s2990_s10 + $0xb0] sm:$0xff] %v1675_v11  ;;  %v1414_v24 = vpop.f32.mrf.mxu1 }
 0x395   : > { %v1673_v10 = vsel %vm1641_vm5, 0.0, %v1414_v24 }
 0x396   : > { %1705 = vst [vmem:[%s2990_s10 + $0xa0] sm:$0xff] %v1673_v10  ;;  %v1960_v16 = vpop.f32.mrf.mxu1 }
 0x397   : > { %v1676_v17 = vsel %vm1644_vm6, 0.0, %v1960_v16 }
 0x398   : > { %1708 = vst [vmem:[%s2990_s10 + $0xb8] sm:$0xff] %v1676_v17  ;;  %v1417_v14 = vpop.f32.mrf.mxu1 }
 0x399   : > { %v1674_v38 = vsel %vm1642_vm7, 0.0, %v1417_v14 }
 0x39a   : > { %1706 = vst [vmem:[%s2990_s10 + $0xa8] sm:$0xff] %v1674_v38  ;;  %v1963_v29 = vpop.f32.mrf.mxu1 }
 0x39b   : > { %v1679_v9 = vsel %vm1647_vm8, 0.0, %v1963_v29 }
 0x39c   : > { %1711 = vst [vmem:[%s2990_s10 + $0xd0] sm:$0xff] %v1679_v9  ;;  %v1430_v6 = vpop.f32.mrf.mxu1 }
 0x39d   : > { %v1677_v37 = vsel %vm1645_vm9, 0.0, %v1430_v6 }
 0x39e   : > { %1709 = vst [vmem:[%s2990_s10 + $0xc0] sm:$0xff] %v1677_v37  ;;  %v1964_v42 = vpop.f32.mrf.mxu1 }
 0x39f   : > { %v1680_v48 = vsel %vm1648_vm10, 0.0, %v1964_v42 }
 0x3a0   : > { %1712 = vst [vmem:[%s2990_s10 + $0xd8] sm:$0xff] %v1680_v48  ;;  %v1433_v15 = vpop.f32.mrf.mxu1 }
 0x3a1   : > { %v1678_v53 = vsel %vm1646_vm11, 0.0, %v1433_v15 }
 0x3a2   : > { %1710 = vst [vmem:[%s2990_s10 + $0xc8] sm:$0xff] %v1678_v53  ;;  %v1967_v22 = vpop.f32.mrf.mxu1 }
 0x3a3   : > { %v1683_v21 = vsel %vm1651_vm12, 0.0, %v1967_v22 }
 0x3a4   : > { %1715 = vst [vmem:[%s2990_s10 + $0xf0] sm:$0xff] %v1683_v21  ;;  %v1446_v44 = vpop.f32.mrf.mxu1 }
 0x3a5   : > { %v1681_v43 = vsel %vm1649_vm13, 0.0, %v1446_v44 }
 0x3a6   : > { %1713 = vst [vmem:[%s2990_s10 + $0xe0] sm:$0xff] %v1681_v43  ;;  %v1968_v27 = vpop.f32.mrf.mxu1 }
 0x3a7   : > { %v1684_v20 = vsel %vm1652_vm14, 0.0, %v1968_v27 }
 0x3a8   : > { %1716 = vst [vmem:[%s2990_s10 + $0xf8] sm:$0xff] %v1684_v20  ;;  %v1449_v31 = vpop.f32.mrf.mxu1 }
 0x3a9   : > { %v1682_v35 = vsel %vm1650_vm15, 0.0, %v1449_v31 }
 0x3aa   : > { %1714 = vst [vmem:[%s2990_s10 + $0xe8] sm:$0xff] %v1682_v35 }
 0x3ab   : > { %2202 = shalt.err (!%p2199_p3)
}
 0x3ac   : > { %s2203_s26 = scalar_lea.hbm %s3031_s15, 4096  ;;  %s2207_s17 = scalar_lea.hbm %s3085_s6, 8192 }
 0x3ad   : > { %p2204_p4 = scmp.ne.s32.totalorder %s3031_s15, %s2203_s26  ;;  %p2208_p9 = scmp.lt.s32.totalorder %s3031_s15, %s3085_s6 }
 0x3ae   : > { %p2209_p10 = scmp.lt.s32.totalorder %s2207_s17, %s2203_s26 }
 0x3af   : > { %p2205_p7 = pnand %p2204_p4, %p2328_p5 }
 0x3b0   : > { %p2210_p11 = por %p2209_p10, %p2208_p9 }
 0x3b1   : > { %p2206_p8 = pneg %p2205_p7 }
 0x3b3   : > { %p2211_p12 = pnand %p2210_p11, %p2206_p8 }
 0x3b5   : > { %2214 = shalt.err (!%p2211_p12)
}
 0x3b6   : > { %s2253_s11 = smov 128   ;;  %s2254_s13 = smov 8  }
 0x3b7   : > { %1969 = dma.vmem_to_hbm [thread:$0]  (%p2328_p5), %s3033_s12, 4096, %s3031_s15, %s3039_s25, %s2253_s11, %s2253_s11, %s2254_s13  }
 0x3b8 PF: > { %p1975_p13 = scmp.ge.s32.totalorder %s2249_s24, 2  ;;  %s1746_s14 = sand.u32 1, %s2237_s21  }
 0x3b9   : > { %s1747_s16 = scalar_lea.sflag [#allocation3], %s1746_s14 }
 0x3ba   : > { %p1972_p0 = pnand %p1975_p13, %p2332_p6 }
 0x3bc   : > { %p1973_p1 = pneg %p1972_p0 }
 0x3be   : > { %2232 = dma.done.wait (%p1973_p1), %s1747_s16, 4096  }
 0x3bf   : > { %2234 = vsyncadd (%p1973_p1), %s1747_s16, 4294963200  ;;  %p16_p2 = scmp.ge.s32.totalorder %s2315_s27, 4   ;;  %s3088_s21 = smov %s2241_s22 }
 0x3c0   : > { %s3089_s22 = smov %s2245_s23  ;;  %s3090_s23 = smov %s2326_s30 }
 0x3c1   : > { %s3091_s24 = smov %s2315_s27  ;;  %18 = sbr.rel (!%p16_p2) target bundleno = 3 (0x3), region = 79 }
 0x3c6   :  { %1752 = vsyncpa [#allocation3], 1 }
 0x3c7   :  { %1754 = vsyncpa [#allocation3 + $0x1], 1 }

</bundles_post_ra>
